<compile_context>
chip_gen: v7x
topology: tpu7x:2x2x1
jax: 0.10.0
libtpu: 0.0.40
codegen_flags: <defaults>
</compile_context>

<pallas_src>
import functools

import jax
import jax.numpy as jnp
from jax.experimental import pallas as pl
from jax.experimental.pallas import tpu as pltpu


def _gru_waypoints_kernel(h0_ref, x0_ref, xin0_ref, w_i0_ref, b_i0_ref,
                          w_f_ref, b_f_ref, w_out_ref, b_out_ref,
                          out_ref, hs_ref, *, hidden, pad, pred_len):
    """Autoregressive GRU rollout: T serial fused MXU matmuls + batched epilogue."""
    H, P, T = hidden, pad, pred_len
    B = h0_ref.shape[0]
    f32 = jnp.float32
    cdt = w_f_ref.dtype            # MXU operand dtype (bf16 in production, f32 for parity check)

    def sigm(v):                   # sigmoid(x) = 0.5*tanh(x/2)+0.5 -> one EUP push per gate
        return 0.5 * jnp.tanh(0.5 * v) + 0.5

    # Step-0 input->gate terms (r|z|n blocks at 128-lane offsets), computed once.
    gi = (jnp.dot(xin0_ref[...].astype(cdt), w_i0_ref[...],
                  preferred_element_type=f32)
          + jnp.broadcast_to(b_i0_ref[...], (B, 3 * P)))
    gi_r = gi[:, 0 * P:0 * P + H]
    gi_z = gi[:, 1 * P:1 * P + H]
    gi_n = gi[:, 2 * P:2 * P + H]

    # Hoisted out of the loop: bias broadcast and the loop-invariant fused weight.
    b_f = jnp.broadcast_to(b_f_ref[...], (B, 6 * P))
    w_f = w_f_ref[...]

    h = h0_ref[...]                # (B, H) f32 hidden state (K is NOT padded to 128)
    for k in range(T):
        # One fused MXU matmul per serial step:
        #   gh_r | gh_z | gh_n | d(gi_r) | d(gi_z) | d(gi_n)
        m = jnp.dot(h.astype(cdt), w_f, preferred_element_type=f32) + b_f   # (B, 6*P)
        if k > 0:
            gi_r = gi_r + m[:, 3 * P:3 * P + H]
            gi_z = gi_z + m[:, 4 * P:4 * P + H]
            gi_n = gi_n + m[:, 5 * P:5 * P + H]
        r = sigm(gi_r + m[:, 0 * P:0 * P + H])
        u = sigm(gi_z + m[:, 1 * P:1 * P + H])
        n = jnp.tanh(gi_n + r * m[:, 2 * P:2 * P + H])
        h = (1.0 - u) * n + u * h
        hs_ref[k * B:(k + 1) * B, :] = h        # stash for epilogue; off the recurrence chain

    # Epilogue (off the serial chain): all dx in ONE batched matmul, then cumulative sum.
    dx = (jnp.dot(hs_ref[...].astype(cdt), w_out_ref[...], preferred_element_type=f32)
          + jnp.broadcast_to(b_out_ref[...], (T * B, P)))
    x = x0_ref[...]                             # (B, P): lanes 0..1 real, rest stay zero
    for k in range(T):
        x = x + dx[k * B:(k + 1) * B, :]
        out_ref[k * B:(k + 1) * B, :] = x.astype(out_ref.dtype)


def prepare_fused_params(params, *, hidden_size, target_point_size, use_tp,
                         compute_dtype=jnp.bfloat16):
    """Re-lay PyTorch-style weights into lane-padded fused matrices (K = H, N = 6*128)."""
    H, Tp = hidden_size, target_point_size
    PAD = 128                                     # gate-block / output lane width

    w_ih, w_hh = params["weight_ih"], params["weight_hh"]      # (3H, 2+Tp), (3H, H)
    b_ih, b_hh = params["bias_ih"], params["bias_hh"]          # (3H,), (3H,)
    w_out, b_out = params["weight_out"], params["bias_out"]    # (2, H), (2,)

    W_i = [w_ih[g * H:(g + 1) * H] for g in range(3)]          # r, z, n
    W_h = [w_hh[g * H:(g + 1) * H] for g in range(3)]
    b_i = [b_ih[g * H:(g + 1) * H] for g in range(3)]
    b_h = [b_hh[g * H:(g + 1) * H] for g in range(3)]

    # Per-step fused weight applied to the (un-padded, K=H) hidden state.
    w_f = jnp.zeros((H, 6 * PAD), jnp.float32)
    b_f = jnp.zeros((1, 6 * PAD), jnp.float32)
    for g in range(3):                                         # gh_r, gh_z, gh_n
        w_f = w_f.at[:, g * PAD:g * PAD + H].set(W_h[g].T)
        b_f = b_f.at[0, g * PAD:g * PAD + H].set(b_h[g])
    for g in range(3):                                         # gi increments via x <- x + dx
        prod = W_i[g][:, :2] @ w_out                           # (H, H)
        w_f = w_f.at[:, (3 + g) * PAD:(3 + g) * PAD + H].set(prod.T)
        b_f = b_f.at[0, (3 + g) * PAD:(3 + g) * PAD + H].set(W_i[g][:, :2] @ b_out)

    # Step-0 input->gates weight (gi_0 = [x0, tp] @ W_ih.T + b_ih).
    din = 2 + Tp if use_tp else 2
    w_i0 = jnp.zeros((din, 3 * PAD), jnp.float32)
    b_i0 = jnp.zeros((1, 3 * PAD), jnp.float32)
    for g in range(3):
        wg = W_i[g] if use_tp else W_i[g][:, :2]
        w_i0 = w_i0.at[:, g * PAD:g * PAD + H].set(wg.T)
        b_i0 = b_i0.at[0, g * PAD:g * PAD + H].set(b_i[g])

    # Epilogue output head (dx = h @ W_out.T + b_out), first 2 lanes real.
    w_o = jnp.zeros((H, PAD), jnp.float32).at[:, :2].set(w_out.T)
    b_o = jnp.zeros((1, PAD), jnp.float32).at[0, :2].set(b_out)

    return {"w_f": w_f.astype(compute_dtype), "b_f": b_f,
            "w_i0": w_i0.astype(compute_dtype), "b_i0": b_i0,
            "w_out": w_o.astype(compute_dtype), "b_out": b_o,
            "pad": PAD}


def gru_waypoints_predictor(z_full, target_point, fused, *, config, pred_len):
    """Wrapper reproducing GRUWaypointsPredictorTransFuser.forward."""
    H = config["gru_hidden_size"]
    B = z_full.shape[0]
    PAD = fused["pad"]

    if config["learn_origin"]:
        x0 = z_full[:, H:H + 2]
        z = z_full[:, :H]
    else:
        x0 = jnp.zeros((B, 2), dtype=z_full.dtype)
        z = z_full

    xin0 = (jnp.concatenate([x0, target_point], axis=1)
            if config["use_tp"] else x0)

    # Layout plumbing (not compute): hidden stays (B, H); only waypoint lanes padded.
    h0 = z.astype(jnp.float32)
    x0p = jnp.pad(x0.astype(jnp.float32), ((0, 0), (0, PAD - 2)))

    kernel = functools.partial(_gru_waypoints_kernel,
                               hidden=H, pad=PAD, pred_len=pred_len)
    vmem = pl.BlockSpec(memory_space=pltpu.MemorySpace.VMEM)

    out = pl.pallas_call(
        kernel,
        out_shape=jax.ShapeDtypeStruct((pred_len * B, PAD), jnp.float32),
        in_specs=[vmem] * 9,
        out_specs=vmem,
        scratch_shapes=[pltpu.VMEM((pred_len * B, H), jnp.float32)],
    )(h0, x0p, xin0.astype(jnp.float32),
      fused["w_i0"], fused["b_i0"], fused["w_f"], fused["b_f"],
      fused["w_out"], fused["b_out"])

    return (out.reshape(pred_len, B, PAD)[:, :, :2]
            .transpose(1, 0, 2).astype(z_full.dtype))


def init_params(key, *, hidden_size, target_point_size):
    """PyTorch-layout parameters (GRUCell r|z|n packing, Linear(H, 2))."""
    H = hidden_size
    input_size = 2 + target_point_size
    lim = 1.0 / (H ** 0.5)
    ks = jax.random.split(key, 6)
    u = lambda k, shape: jax.random.uniform(k, shape, minval=-lim, maxval=lim,
                                            dtype=jnp.float32)
    return {
        "weight_ih": u(ks[0], (3 * H, input_size)),
        "weight_hh": u(ks[1], (3 * H, H)),
        "bias_ih": u(ks[2], (3 * H,)),
        "bias_hh": u(ks[3], (3 * H,)),
        "weight_out": u(ks[4], (2, H)),
        "bias_out": u(ks[5], (2,)),
    }


def reference_forward(z_full, target_point, params, *, config, pred_len):
    """Plain-JAX reference mirroring the PyTorch forward (for validation)."""
    H = config["gru_hidden_size"]
    B = z_full.shape[0]
    if config["learn_origin"]:
        x = z_full[:, H:H + 2]
        h = z_full[:, :H]
    else:
        x = jnp.zeros((B, 2), dtype=z_full.dtype)
        h = z_full
    w_ih, w_hh = params["weight_ih"], params["weight_hh"]
    b_ih, b_hh = params["bias_ih"], params["bias_hh"]
    w_out, b_out = params["weight_out"], params["bias_out"]
    outs = []
    for _ in range(pred_len):
        x_in = jnp.concatenate([x, target_point], axis=1) if config["use_tp"] else x
        gi = x_in @ w_ih.T + b_ih
        gh = h @ w_hh.T + b_hh
        i_r, i_z, i_n = gi[:, :H], gi[:, H:2 * H], gi[:, 2 * H:]
        h_r, h_z, h_n = gh[:, :H], gh[:, H:2 * H], gh[:, 2 * H:]
        r = jax.nn.sigmoid(i_r + h_r)
        u_ = jax.nn.sigmoid(i_z + h_z)
        n = jnp.tanh(i_n + r * h_n)
        h = (1.0 - u_) * n + u_ * h
        dx = h @ w_out.T + b_out
        x = dx + x
        outs.append(x)
    return jnp.stack(outs, axis=1)


if __name__ == "__main__":
    # Small shapes consistent with the module: batch=2, hidden=32,
    # target_point_size=2, pred_len=8, learn_origin + use_tp enabled.
    B = 2
    HIDDEN = 32
    TP_SIZE = 2
    PRED_LEN = 8
    config = {"learn_origin": True, "use_tp": True, "gru_hidden_size": HIDDEN}

    key = jax.random.PRNGKey(0)
    k_params, k_z, k_tp = jax.random.split(key, 3)

    params = init_params(k_params, hidden_size=HIDDEN, target_point_size=TP_SIZE)

    # learn_origin=True -> z carries hidden state + learned origin (hidden+2)
    z_full = jax.random.normal(k_z, (B, HIDDEN + 2), dtype=jnp.float32)
    target_point = jax.random.normal(k_tp, (B, TP_SIZE), dtype=jnp.float32)

    ref = reference_forward(
        z_full, target_point, params, config=config, pred_len=PRED_LEN)

    # 1) Exact-parity check of the fused algebra with f32 MXU operands.
    fused_f32 = prepare_fused_params(
        params, hidden_size=HIDDEN, target_point_size=TP_SIZE,
        use_tp=config["use_tp"], compute_dtype=jnp.float32)
    out_f32 = gru_waypoints_predictor(
        z_full, target_point, fused_f32, config=config, pred_len=PRED_LEN)
    out_f32 = jax.block_until_ready(out_f32)
    assert out_f32.shape == (B, PRED_LEN, 2)
    err_f32 = jnp.max(jnp.abs(out_f32 - ref))
    assert jnp.allclose(out_f32, ref, atol=1e-4, rtol=1e-4), \
        f"f32 path max abs err {err_f32}"

    # 2) Production bf16-MXU path (single-pass MXU); f32 gate math + accumulation,
    #    so only the weight/activation rounding accumulates over 8 recurrent steps.
    fused_bf16 = prepare_fused_params(
        params, hidden_size=HIDDEN, target_point_size=TP_SIZE,
        use_tp=config["use_tp"], compute_dtype=jnp.bfloat16)
    pred_wp = gru_waypoints_predictor(
        z_full, target_point, fused_bf16, config=config, pred_len=PRED_LEN)
    pred_wp = jax.block_until_ready(pred_wp)
    assert pred_wp.shape == (B, PRED_LEN, 2)
    err_bf16 = jnp.max(jnp.abs(pred_wp - ref))
    assert jnp.allclose(pred_wp, ref, atol=5e-2, rtol=5e-2), \
        f"bf16 path max abs err {err_bf16}"

    print("KERNEL_OK")
</pallas_src>

<mosaic_0001>
module attributes {stable_mosaic.version = 11 : i64} {
  func.func @_gru_waypoints_kernel(%arg0: memref<2x32xf32, #tpu.memory_space<vmem>>, %arg1: memref<2x128xf32, #tpu.memory_space<vmem>>, %arg2: memref<2x4xf32, #tpu.memory_space<vmem>>, %arg3: memref<4x384xf32, #tpu.memory_space<vmem>>, %arg4: memref<1x384xf32, #tpu.memory_space<vmem>>, %arg5: memref<32x768xf32, #tpu.memory_space<vmem>>, %arg6: memref<1x768xf32, #tpu.memory_space<vmem>>, %arg7: memref<32x128xf32, #tpu.memory_space<vmem>>, %arg8: memref<1x128xf32, #tpu.memory_space<vmem>>, %arg9: memref<16x128xf32, #tpu.memory_space<vmem>>, %arg10: memref<16x32xf32, #tpu.memory_space<vmem>>) attributes {dimension_semantics = [], scalar_prefetch = 0 : i64, scratch_operands = 1 : i64, tpu.core_type = #tpu.core_type<tc>} {
    %c0 = arith.constant 0 : index
    %c0_0 = arith.constant 0 : index
    %0 = vector.load %arg2[%c0, %c0_0] : memref<2x4xf32, #tpu.memory_space<vmem>>, vector<2x4xf32>
    %c0_1 = arith.constant 0 : index
    %c0_2 = arith.constant 0 : index
    %1 = vector.load %arg3[%c0_1, %c0_2] : memref<4x384xf32, #tpu.memory_space<vmem>>, vector<4x384xf32>
    %cst = arith.constant dense<0.000000e+00> : vector<2x384xf32>
    %2 = tpu.matmul %0, %1, %cst {dimension_numbers = #tpu.dot_dimension_numbers<[1], [0], [0], [1], [0, 0, 1, 1], [], []>} : vector<2x4xf32>, vector<4x384xf32>, vector<2x384xf32> -> vector<2x384xf32>
    %c0_3 = arith.constant 0 : index
    %c0_4 = arith.constant 0 : index
    %3 = vector.load %arg4[%c0_3, %c0_4] : memref<1x384xf32, #tpu.memory_space<vmem>>, vector<1x384xf32>
    %4 = vector.shape_cast %3 : vector<1x384xf32> to vector<1x384xf32>
    %5 = vector.broadcast %4 : vector<1x384xf32> to vector<2x384xf32>
    %6 = arith.addf %2, %5 : vector<2x384xf32>
    %7 = vector.extract_strided_slice %6 {offsets = [0, 0], sizes = [2, 32], strides = [1, 1]} : vector<2x384xf32> to vector<2x32xf32>
    %8 = vector.extract_strided_slice %6 {offsets = [0, 128], sizes = [2, 32], strides = [1, 1]} : vector<2x384xf32> to vector<2x32xf32>
    %9 = vector.extract_strided_slice %6 {offsets = [0, 256], sizes = [2, 32], strides = [1, 1]} : vector<2x384xf32> to vector<2x32xf32>
    %c0_5 = arith.constant 0 : index
    %c0_6 = arith.constant 0 : index
    %10 = vector.load %arg6[%c0_5, %c0_6] : memref<1x768xf32, #tpu.memory_space<vmem>>, vector<1x768xf32>
    %11 = vector.shape_cast %10 : vector<1x768xf32> to vector<1x768xf32>
    %12 = vector.broadcast %11 : vector<1x768xf32> to vector<2x768xf32>
    %c0_7 = arith.constant 0 : index
    %c0_8 = arith.constant 0 : index
    %13 = vector.load %arg5[%c0_7, %c0_8] : memref<32x768xf32, #tpu.memory_space<vmem>>, vector<32x768xf32>
    %c0_9 = arith.constant 0 : index
    %c0_10 = arith.constant 0 : index
    %14 = vector.load %arg0[%c0_9, %c0_10] : memref<2x32xf32, #tpu.memory_space<vmem>>, vector<2x32xf32>
    %cst_11 = arith.constant dense<0.000000e+00> : vector<2x768xf32>
    %15 = tpu.matmul %14, %13, %cst_11 {dimension_numbers = #tpu.dot_dimension_numbers<[1], [0], [0], [1], [0, 0, 1, 1], [], []>} : vector<2x32xf32>, vector<32x768xf32>, vector<2x768xf32> -> vector<2x768xf32>
    %16 = arith.addf %15, %12 : vector<2x768xf32>
    %17 = vector.extract_strided_slice %16 {offsets = [0, 0], sizes = [2, 32], strides = [1, 1]} : vector<2x768xf32> to vector<2x32xf32>
    %18 = arith.addf %7, %17 : vector<2x32xf32>
    %cst_12 = arith.constant 5.000000e-01 : f32
    %19 = vector.broadcast %cst_12 : f32 to vector<2x32xf32>
    %20 = arith.mulf %19, %18 : vector<2x32xf32>
    %21 = math.tanh %20 : vector<2x32xf32>
    %cst_13 = arith.constant 5.000000e-01 : f32
    %22 = vector.broadcast %cst_13 : f32 to vector<2x32xf32>
    %23 = arith.mulf %22, %21 : vector<2x32xf32>
    %cst_14 = arith.constant 5.000000e-01 : f32
    %24 = vector.broadcast %cst_14 : f32 to vector<2x32xf32>
    %25 = arith.addf %23, %24 : vector<2x32xf32>
    %26 = vector.extract_strided_slice %16 {offsets = [0, 128], sizes = [2, 32], strides = [1, 1]} : vector<2x768xf32> to vector<2x32xf32>
    %27 = arith.addf %8, %26 : vector<2x32xf32>
    %cst_15 = arith.constant 5.000000e-01 : f32
    %28 = vector.broadcast %cst_15 : f32 to vector<2x32xf32>
    %29 = arith.mulf %28, %27 : vector<2x32xf32>
    %30 = math.tanh %29 : vector<2x32xf32>
    %cst_16 = arith.constant 5.000000e-01 : f32
    %31 = vector.broadcast %cst_16 : f32 to vector<2x32xf32>
    %32 = arith.mulf %31, %30 : vector<2x32xf32>
    %cst_17 = arith.constant 5.000000e-01 : f32
    %33 = vector.broadcast %cst_17 : f32 to vector<2x32xf32>
    %34 = arith.addf %32, %33 : vector<2x32xf32>
    %35 = vector.extract_strided_slice %16 {offsets = [0, 256], sizes = [2, 32], strides = [1, 1]} : vector<2x768xf32> to vector<2x32xf32>
    %36 = arith.mulf %25, %35 : vector<2x32xf32>
    %37 = arith.addf %9, %36 : vector<2x32xf32>
    %38 = math.tanh %37 : vector<2x32xf32>
    %cst_18 = arith.constant 1.000000e+00 : f32
    %39 = vector.broadcast %cst_18 : f32 to vector<2x32xf32>
    %40 = arith.subf %39, %34 : vector<2x32xf32>
    %41 = arith.mulf %40, %38 : vector<2x32xf32>
    %42 = arith.mulf %34, %14 : vector<2x32xf32>
    %43 = arith.addf %41, %42 : vector<2x32xf32>
    %c0_19 = arith.constant 0 : index
    %c0_20 = arith.constant 0 : index
    %44 = vector.load %arg10[%c0_19, %c0_20] : memref<16x32xf32, #tpu.memory_space<vmem>>, vector<2x32xf32>
    tpu.vector_store %arg10[%c0_19, %c0_20], %43 {strides = array<i32>} : memref<16x32xf32, #tpu.memory_space<vmem>>, vector<2x32xf32>,
    %cst_21 = arith.constant dense<0.000000e+00> : vector<2x768xf32>
    %45 = tpu.matmul %43, %13, %cst_21 {dimension_numbers = #tpu.dot_dimension_numbers<[1], [0], [0], [1], [0, 0, 1, 1], [], []>} : vector<2x32xf32>, vector<32x768xf32>, vector<2x768xf32> -> vector<2x768xf32>
    %46 = arith.addf %45, %12 : vector<2x768xf32>
    %47 = vector.extract_strided_slice %46 {offsets = [0, 384], sizes = [2, 32], strides = [1, 1]} : vector<2x768xf32> to vector<2x32xf32>
    %48 = arith.addf %7, %47 : vector<2x32xf32>
    %49 = vector.extract_strided_slice %46 {offsets = [0, 512], sizes = [2, 32], strides = [1, 1]} : vector<2x768xf32> to vector<2x32xf32>
    %50 = arith.addf %8, %49 : vector<2x32xf32>
    %51 = vector.extract_strided_slice %46 {offsets = [0, 640], sizes = [2, 32], strides = [1, 1]} : vector<2x768xf32> to vector<2x32xf32>
    %52 = arith.addf %9, %51 : vector<2x32xf32>
    %53 = vector.extract_strided_slice %46 {offsets = [0, 0], sizes = [2, 32], strides = [1, 1]} : vector<2x768xf32> to vector<2x32xf32>
    %54 = arith.addf %48, %53 : vector<2x32xf32>
    %cst_22 = arith.constant 5.000000e-01 : f32
    %55 = vector.broadcast %cst_22 : f32 to vector<2x32xf32>
    %56 = arith.mulf %55, %54 : vector<2x32xf32>
    %57 = math.tanh %56 : vector<2x32xf32>
    %cst_23 = arith.constant 5.000000e-01 : f32
    %58 = vector.broadcast %cst_23 : f32 to vector<2x32xf32>
    %59 = arith.mulf %58, %57 : vector<2x32xf32>
    %cst_24 = arith.constant 5.000000e-01 : f32
    %60 = vector.broadcast %cst_24 : f32 to vector<2x32xf32>
    %61 = arith.addf %59, %60 : vector<2x32xf32>
    %62 = vector.extract_strided_slice %46 {offsets = [0, 128], sizes = [2, 32], strides = [1, 1]} : vector<2x768xf32> to vector<2x32xf32>
    %63 = arith.addf %50, %62 : vector<2x32xf32>
    %cst_25 = arith.constant 5.000000e-01 : f32
    %64 = vector.broadcast %cst_25 : f32 to vector<2x32xf32>
    %65 = arith.mulf %64, %63 : vector<2x32xf32>
    %66 = math.tanh %65 : vector<2x32xf32>
    %cst_26 = arith.constant 5.000000e-01 : f32
    %67 = vector.broadcast %cst_26 : f32 to vector<2x32xf32>
    %68 = arith.mulf %67, %66 : vector<2x32xf32>
    %cst_27 = arith.constant 5.000000e-01 : f32
    %69 = vector.broadcast %cst_27 : f32 to vector<2x32xf32>
    %70 = arith.addf %68, %69 : vector<2x32xf32>
    %71 = vector.extract_strided_slice %46 {offsets = [0, 256], sizes = [2, 32], strides = [1, 1]} : vector<2x768xf32> to vector<2x32xf32>
    %72 = arith.mulf %61, %71 : vector<2x32xf32>
    %73 = arith.addf %52, %72 : vector<2x32xf32>
    %74 = math.tanh %73 : vector<2x32xf32>
    %cst_28 = arith.constant 1.000000e+00 : f32
    %75 = vector.broadcast %cst_28 : f32 to vector<2x32xf32>
    %76 = arith.subf %75, %70 : vector<2x32xf32>
    %77 = arith.mulf %76, %74 : vector<2x32xf32>
    %78 = arith.mulf %70, %43 : vector<2x32xf32>
    %79 = arith.addf %77, %78 : vector<2x32xf32>
    %c2 = arith.constant 2 : index
    %c0_29 = arith.constant 0 : index
    %80 = vector.load %arg10[%c2, %c0_29] : memref<16x32xf32, #tpu.memory_space<vmem>>, vector<2x32xf32>
    tpu.vector_store %arg10[%c2, %c0_29], %79 {strides = array<i32>} : memref<16x32xf32, #tpu.memory_space<vmem>>, vector<2x32xf32>,
    %cst_30 = arith.constant dense<0.000000e+00> : vector<2x768xf32>
    %81 = tpu.matmul %79, %13, %cst_30 {dimension_numbers = #tpu.dot_dimension_numbers<[1], [0], [0], [1], [0, 0, 1, 1], [], []>} : vector<2x32xf32>, vector<32x768xf32>, vector<2x768xf32> -> vector<2x768xf32>
    %82 = arith.addf %81, %12 : vector<2x768xf32>
    %83 = vector.extract_strided_slice %82 {offsets = [0, 384], sizes = [2, 32], strides = [1, 1]} : vector<2x768xf32> to vector<2x32xf32>
    %84 = arith.addf %48, %83 : vector<2x32xf32>
    %85 = vector.extract_strided_slice %82 {offsets = [0, 512], sizes = [2, 32], strides = [1, 1]} : vector<2x768xf32> to vector<2x32xf32>
    %86 = arith.addf %50, %85 : vector<2x32xf32>
    %87 = vector.extract_strided_slice %82 {offsets = [0, 640], sizes = [2, 32], strides = [1, 1]} : vector<2x768xf32> to vector<2x32xf32>
    %88 = arith.addf %52, %87 : vector<2x32xf32>
    %89 = vector.extract_strided_slice %82 {offsets = [0, 0], sizes = [2, 32], strides = [1, 1]} : vector<2x768xf32> to vector<2x32xf32>
    %90 = arith.addf %84, %89 : vector<2x32xf32>
    %cst_31 = arith.constant 5.000000e-01 : f32
    %91 = vector.broadcast %cst_31 : f32 to vector<2x32xf32>
    %92 = arith.mulf %91, %90 : vector<2x32xf32>
    %93 = math.tanh %92 : vector<2x32xf32>
    %cst_32 = arith.constant 5.000000e-01 : f32
    %94 = vector.broadcast %cst_32 : f32 to vector<2x32xf32>
    %95 = arith.mulf %94, %93 : vector<2x32xf32>
    %cst_33 = arith.constant 5.000000e-01 : f32
    %96 = vector.broadcast %cst_33 : f32 to vector<2x32xf32>
    %97 = arith.addf %95, %96 : vector<2x32xf32>
    %98 = vector.extract_strided_slice %82 {offsets = [0, 128], sizes = [2, 32], strides = [1, 1]} : vector<2x768xf32> to vector<2x32xf32>
    %99 = arith.addf %86, %98 : vector<2x32xf32>
    %cst_34 = arith.constant 5.000000e-01 : f32
    %100 = vector.broadcast %cst_34 : f32 to vector<2x32xf32>
    %101 = arith.mulf %100, %99 : vector<2x32xf32>
    %102 = math.tanh %101 : vector<2x32xf32>
    %cst_35 = arith.constant 5.000000e-01 : f32
    %103 = vector.broadcast %cst_35 : f32 to vector<2x32xf32>
    %104 = arith.mulf %103, %102 : vector<2x32xf32>
    %cst_36 = arith.constant 5.000000e-01 : f32
    %105 = vector.broadcast %cst_36 : f32 to vector<2x32xf32>
    %106 = arith.addf %104, %105 : vector<2x32xf32>
    %107 = vector.extract_strided_slice %82 {offsets = [0, 256], sizes = [2, 32], strides = [1, 1]} : vector<2x768xf32> to vector<2x32xf32>
    %108 = arith.mulf %97, %107 : vector<2x32xf32>
    %109 = arith.addf %88, %108 : vector<2x32xf32>
    %110 = math.tanh %109 : vector<2x32xf32>
    %cst_37 = arith.constant 1.000000e+00 : f32
    %111 = vector.broadcast %cst_37 : f32 to vector<2x32xf32>
    %112 = arith.subf %111, %106 : vector<2x32xf32>
    %113 = arith.mulf %112, %110 : vector<2x32xf32>
    %114 = arith.mulf %106, %79 : vector<2x32xf32>
    %115 = arith.addf %113, %114 : vector<2x32xf32>
    %c4 = arith.constant 4 : index
    %c0_38 = arith.constant 0 : index
    %116 = vector.load %arg10[%c4, %c0_38] : memref<16x32xf32, #tpu.memory_space<vmem>>, vector<2x32xf32>
    tpu.vector_store %arg10[%c4, %c0_38], %115 {strides = array<i32>} : memref<16x32xf32, #tpu.memory_space<vmem>>, vector<2x32xf32>,
    %cst_39 = arith.constant dense<0.000000e+00> : vector<2x768xf32>
    %117 = tpu.matmul %115, %13, %cst_39 {dimension_numbers = #tpu.dot_dimension_numbers<[1], [0], [0], [1], [0, 0, 1, 1], [], []>} : vector<2x32xf32>, vector<32x768xf32>, vector<2x768xf32> -> vector<2x768xf32>
    %118 = arith.addf %117, %12 : vector<2x768xf32>
    %119 = vector.extract_strided_slice %118 {offsets = [0, 384], sizes = [2, 32], strides = [1, 1]} : vector<2x768xf32> to vector<2x32xf32>
    %120 = arith.addf %84, %119 : vector<2x32xf32>
    %121 = vector.extract_strided_slice %118 {offsets = [0, 512], sizes = [2, 32], strides = [1, 1]} : vector<2x768xf32> to vector<2x32xf32>
    %122 = arith.addf %86, %121 : vector<2x32xf32>
    %123 = vector.extract_strided_slice %118 {offsets = [0, 640], sizes = [2, 32], strides = [1, 1]} : vector<2x768xf32> to vector<2x32xf32>
    %124 = arith.addf %88, %123 : vector<2x32xf32>
    %125 = vector.extract_strided_slice %118 {offsets = [0, 0], sizes = [2, 32], strides = [1, 1]} : vector<2x768xf32> to vector<2x32xf32>
    %126 = arith.addf %120, %125 : vector<2x32xf32>
    %cst_40 = arith.constant 5.000000e-01 : f32
    %127 = vector.broadcast %cst_40 : f32 to vector<2x32xf32>
    %128 = arith.mulf %127, %126 : vector<2x32xf32>
    %129 = math.tanh %128 : vector<2x32xf32>
    %cst_41 = arith.constant 5.000000e-01 : f32
    %130 = vector.broadcast %cst_41 : f32 to vector<2x32xf32>
    %131 = arith.mulf %130, %129 : vector<2x32xf32>
    %cst_42 = arith.constant 5.000000e-01 : f32
    %132 = vector.broadcast %cst_42 : f32 to vector<2x32xf32>
    %133 = arith.addf %131, %132 : vector<2x32xf32>
    %134 = vector.extract_strided_slice %118 {offsets = [0, 128], sizes = [2, 32], strides = [1, 1]} : vector<2x768xf32> to vector<2x32xf32>
    %135 = arith.addf %122, %134 : vector<2x32xf32>
    %cst_43 = arith.constant 5.000000e-01 : f32
    %136 = vector.broadcast %cst_43 : f32 to vector<2x32xf32>
    %137 = arith.mulf %136, %135 : vector<2x32xf32>
    %138 = math.tanh %137 : vector<2x32xf32>
    %cst_44 = arith.constant 5.000000e-01 : f32
    %139 = vector.broadcast %cst_44 : f32 to vector<2x32xf32>
    %140 = arith.mulf %139, %138 : vector<2x32xf32>
    %cst_45 = arith.constant 5.000000e-01 : f32
    %141 = vector.broadcast %cst_45 : f32 to vector<2x32xf32>
    %142 = arith.addf %140, %141 : vector<2x32xf32>
    %143 = vector.extract_strided_slice %118 {offsets = [0, 256], sizes = [2, 32], strides = [1, 1]} : vector<2x768xf32> to vector<2x32xf32>
    %144 = arith.mulf %133, %143 : vector<2x32xf32>
    %145 = arith.addf %124, %144 : vector<2x32xf32>
    %146 = math.tanh %145 : vector<2x32xf32>
    %cst_46 = arith.constant 1.000000e+00 : f32
    %147 = vector.broadcast %cst_46 : f32 to vector<2x32xf32>
    %148 = arith.subf %147, %142 : vector<2x32xf32>
    %149 = arith.mulf %148, %146 : vector<2x32xf32>
    %150 = arith.mulf %142, %115 : vector<2x32xf32>
    %151 = arith.addf %149, %150 : vector<2x32xf32>
    %c6 = arith.constant 6 : index
    %c0_47 = arith.constant 0 : index
    %152 = vector.load %arg10[%c6, %c0_47] : memref<16x32xf32, #tpu.memory_space<vmem>>, vector<2x32xf32>
    tpu.vector_store %arg10[%c6, %c0_47], %151 {strides = array<i32>} : memref<16x32xf32, #tpu.memory_space<vmem>>, vector<2x32xf32>,
    %cst_48 = arith.constant dense<0.000000e+00> : vector<2x768xf32>
    %153 = tpu.matmul %151, %13, %cst_48 {dimension_numbers = #tpu.dot_dimension_numbers<[1], [0], [0], [1], [0, 0, 1, 1], [], []>} : vector<2x32xf32>, vector<32x768xf32>, vector<2x768xf32> -> vector<2x768xf32>
    %154 = arith.addf %153, %12 : vector<2x768xf32>
    %155 = vector.extract_strided_slice %154 {offsets = [0, 384], sizes = [2, 32], strides = [1, 1]} : vector<2x768xf32> to vector<2x32xf32>
    %156 = arith.addf %120, %155 : vector<2x32xf32>
    %157 = vector.extract_strided_slice %154 {offsets = [0, 512], sizes = [2, 32], strides = [1, 1]} : vector<2x768xf32> to vector<2x32xf32>
    %158 = arith.addf %122, %157 : vector<2x32xf32>
    %159 = vector.extract_strided_slice %154 {offsets = [0, 640], sizes = [2, 32], strides = [1, 1]} : vector<2x768xf32> to vector<2x32xf32>
    %160 = arith.addf %124, %159 : vector<2x32xf32>
    %161 = vector.extract_strided_slice %154 {offsets = [0, 0], sizes = [2, 32], strides = [1, 1]} : vector<2x768xf32> to vector<2x32xf32>
    %162 = arith.addf %156, %161 : vector<2x32xf32>
    %cst_49 = arith.constant 5.000000e-01 : f32
    %163 = vector.broadcast %cst_49 : f32 to vector<2x32xf32>
    %164 = arith.mulf %163, %162 : vector<2x32xf32>
    %165 = math.tanh %164 : vector<2x32xf32>
    %cst_50 = arith.constant 5.000000e-01 : f32
    %166 = vector.broadcast %cst_50 : f32 to vector<2x32xf32>
    %167 = arith.mulf %166, %165 : vector<2x32xf32>
    %cst_51 = arith.constant 5.000000e-01 : f32
    %168 = vector.broadcast %cst_51 : f32 to vector<2x32xf32>
    %169 = arith.addf %167, %168 : vector<2x32xf32>
    %170 = vector.extract_strided_slice %154 {offsets = [0, 128], sizes = [2, 32], strides = [1, 1]} : vector<2x768xf32> to vector<2x32xf32>
    %171 = arith.addf %158, %170 : vector<2x32xf32>
    %cst_52 = arith.constant 5.000000e-01 : f32
    %172 = vector.broadcast %cst_52 : f32 to vector<2x32xf32>
    %173 = arith.mulf %172, %171 : vector<2x32xf32>
    %174 = math.tanh %173 : vector<2x32xf32>
    %cst_53 = arith.constant 5.000000e-01 : f32
    %175 = vector.broadcast %cst_53 : f32 to vector<2x32xf32>
    %176 = arith.mulf %175, %174 : vector<2x32xf32>
    %cst_54 = arith.constant 5.000000e-01 : f32
    %177 = vector.broadcast %cst_54 : f32 to vector<2x32xf32>
    %178 = arith.addf %176, %177 : vector<2x32xf32>
    %179 = vector.extract_strided_slice %154 {offsets = [0, 256], sizes = [2, 32], strides = [1, 1]} : vector<2x768xf32> to vector<2x32xf32>
    %180 = arith.mulf %169, %179 : vector<2x32xf32>
    %181 = arith.addf %160, %180 : vector<2x32xf32>
    %182 = math.tanh %181 : vector<2x32xf32>
    %cst_55 = arith.constant 1.000000e+00 : f32
    %183 = vector.broadcast %cst_55 : f32 to vector<2x32xf32>
    %184 = arith.subf %183, %178 : vector<2x32xf32>
    %185 = arith.mulf %184, %182 : vector<2x32xf32>
    %186 = arith.mulf %178, %151 : vector<2x32xf32>
    %187 = arith.addf %185, %186 : vector<2x32xf32>
    %c8 = arith.constant 8 : index
    %c0_56 = arith.constant 0 : index
    %188 = vector.load %arg10[%c8, %c0_56] : memref<16x32xf32, #tpu.memory_space<vmem>>, vector<2x32xf32>
    tpu.vector_store %arg10[%c8, %c0_56], %187 {strides = array<i32>} : memref<16x32xf32, #tpu.memory_space<vmem>>, vector<2x32xf32>,
    %cst_57 = arith.constant dense<0.000000e+00> : vector<2x768xf32>
    %189 = tpu.matmul %187, %13, %cst_57 {dimension_numbers = #tpu.dot_dimension_numbers<[1], [0], [0], [1], [0, 0, 1, 1], [], []>} : vector<2x32xf32>, vector<32x768xf32>, vector<2x768xf32> -> vector<2x768xf32>
    %190 = arith.addf %189, %12 : vector<2x768xf32>
    %191 = vector.extract_strided_slice %190 {offsets = [0, 384], sizes = [2, 32], strides = [1, 1]} : vector<2x768xf32> to vector<2x32xf32>
    %192 = arith.addf %156, %191 : vector<2x32xf32>
    %193 = vector.extract_strided_slice %190 {offsets = [0, 512], sizes = [2, 32], strides = [1, 1]} : vector<2x768xf32> to vector<2x32xf32>
    %194 = arith.addf %158, %193 : vector<2x32xf32>
    %195 = vector.extract_strided_slice %190 {offsets = [0, 640], sizes = [2, 32], strides = [1, 1]} : vector<2x768xf32> to vector<2x32xf32>
    %196 = arith.addf %160, %195 : vector<2x32xf32>
    %197 = vector.extract_strided_slice %190 {offsets = [0, 0], sizes = [2, 32], strides = [1, 1]} : vector<2x768xf32> to vector<2x32xf32>
    %198 = arith.addf %192, %197 : vector<2x32xf32>
    %cst_58 = arith.constant 5.000000e-01 : f32
    %199 = vector.broadcast %cst_58 : f32 to vector<2x32xf32>
    %200 = arith.mulf %199, %198 : vector<2x32xf32>
    %201 = math.tanh %200 : vector<2x32xf32>
    %cst_59 = arith.constant 5.000000e-01 : f32
    %202 = vector.broadcast %cst_59 : f32 to vector<2x32xf32>
    %203 = arith.mulf %202, %201 : vector<2x32xf32>
    %cst_60 = arith.constant 5.000000e-01 : f32
    %204 = vector.broadcast %cst_60 : f32 to vector<2x32xf32>
    %205 = arith.addf %203, %204 : vector<2x32xf32>
    %206 = vector.extract_strided_slice %190 {offsets = [0, 128], sizes = [2, 32], strides = [1, 1]} : vector<2x768xf32> to vector<2x32xf32>
    %207 = arith.addf %194, %206 : vector<2x32xf32>
    %cst_61 = arith.constant 5.000000e-01 : f32
    %208 = vector.broadcast %cst_61 : f32 to vector<2x32xf32>
    %209 = arith.mulf %208, %207 : vector<2x32xf32>
    %210 = math.tanh %209 : vector<2x32xf32>
    %cst_62 = arith.constant 5.000000e-01 : f32
    %211 = vector.broadcast %cst_62 : f32 to vector<2x32xf32>
    %212 = arith.mulf %211, %210 : vector<2x32xf32>
    %cst_63 = arith.constant 5.000000e-01 : f32
    %213 = vector.broadcast %cst_63 : f32 to vector<2x32xf32>
    %214 = arith.addf %212, %213 : vector<2x32xf32>
    %215 = vector.extract_strided_slice %190 {offsets = [0, 256], sizes = [2, 32], strides = [1, 1]} : vector<2x768xf32> to vector<2x32xf32>
    %216 = arith.mulf %205, %215 : vector<2x32xf32>
    %217 = arith.addf %196, %216 : vector<2x32xf32>
    %218 = math.tanh %217 : vector<2x32xf32>
    %cst_64 = arith.constant 1.000000e+00 : f32
    %219 = vector.broadcast %cst_64 : f32 to vector<2x32xf32>
    %220 = arith.subf %219, %214 : vector<2x32xf32>
    %221 = arith.mulf %220, %218 : vector<2x32xf32>
    %222 = arith.mulf %214, %187 : vector<2x32xf32>
    %223 = arith.addf %221, %222 : vector<2x32xf32>
    %c10 = arith.constant 10 : index
    %c0_65 = arith.constant 0 : index
    %224 = vector.load %arg10[%c10, %c0_65] : memref<16x32xf32, #tpu.memory_space<vmem>>, vector<2x32xf32>
    tpu.vector_store %arg10[%c10, %c0_65], %223 {strides = array<i32>} : memref<16x32xf32, #tpu.memory_space<vmem>>, vector<2x32xf32>,
    %cst_66 = arith.constant dense<0.000000e+00> : vector<2x768xf32>
    %225 = tpu.matmul %223, %13, %cst_66 {dimension_numbers = #tpu.dot_dimension_numbers<[1], [0], [0], [1], [0, 0, 1, 1], [], []>} : vector<2x32xf32>, vector<32x768xf32>, vector<2x768xf32> -> vector<2x768xf32>
    %226 = arith.addf %225, %12 : vector<2x768xf32>
    %227 = vector.extract_strided_slice %226 {offsets = [0, 384], sizes = [2, 32], strides = [1, 1]} : vector<2x768xf32> to vector<2x32xf32>
    %228 = arith.addf %192, %227 : vector<2x32xf32>
    %229 = vector.extract_strided_slice %226 {offsets = [0, 512], sizes = [2, 32], strides = [1, 1]} : vector<2x768xf32> to vector<2x32xf32>
    %230 = arith.addf %194, %229 : vector<2x32xf32>
    %231 = vector.extract_strided_slice %226 {offsets = [0, 640], sizes = [2, 32], strides = [1, 1]} : vector<2x768xf32> to vector<2x32xf32>
    %232 = arith.addf %196, %231 : vector<2x32xf32>
    %233 = vector.extract_strided_slice %226 {offsets = [0, 0], sizes = [2, 32], strides = [1, 1]} : vector<2x768xf32> to vector<2x32xf32>
    %234 = arith.addf %228, %233 : vector<2x32xf32>
    %cst_67 = arith.constant 5.000000e-01 : f32
    %235 = vector.broadcast %cst_67 : f32 to vector<2x32xf32>
    %236 = arith.mulf %235, %234 : vector<2x32xf32>
    %237 = math.tanh %236 : vector<2x32xf32>
    %cst_68 = arith.constant 5.000000e-01 : f32
    %238 = vector.broadcast %cst_68 : f32 to vector<2x32xf32>
    %239 = arith.mulf %238, %237 : vector<2x32xf32>
    %cst_69 = arith.constant 5.000000e-01 : f32
    %240 = vector.broadcast %cst_69 : f32 to vector<2x32xf32>
    %241 = arith.addf %239, %240 : vector<2x32xf32>
    %242 = vector.extract_strided_slice %226 {offsets = [0, 128], sizes = [2, 32], strides = [1, 1]} : vector<2x768xf32> to vector<2x32xf32>
    %243 = arith.addf %230, %242 : vector<2x32xf32>
    %cst_70 = arith.constant 5.000000e-01 : f32
    %244 = vector.broadcast %cst_70 : f32 to vector<2x32xf32>
    %245 = arith.mulf %244, %243 : vector<2x32xf32>
    %246 = math.tanh %245 : vector<2x32xf32>
    %cst_71 = arith.constant 5.000000e-01 : f32
    %247 = vector.broadcast %cst_71 : f32 to vector<2x32xf32>
    %248 = arith.mulf %247, %246 : vector<2x32xf32>
    %cst_72 = arith.constant 5.000000e-01 : f32
    %249 = vector.broadcast %cst_72 : f32 to vector<2x32xf32>
    %250 = arith.addf %248, %249 : vector<2x32xf32>
    %251 = vector.extract_strided_slice %226 {offsets = [0, 256], sizes = [2, 32], strides = [1, 1]} : vector<2x768xf32> to vector<2x32xf32>
    %252 = arith.mulf %241, %251 : vector<2x32xf32>
    %253 = arith.addf %232, %252 : vector<2x32xf32>
    %254 = math.tanh %253 : vector<2x32xf32>
    %cst_73 = arith.constant 1.000000e+00 : f32
    %255 = vector.broadcast %cst_73 : f32 to vector<2x32xf32>
    %256 = arith.subf %255, %250 : vector<2x32xf32>
    %257 = arith.mulf %256, %254 : vector<2x32xf32>
    %258 = arith.mulf %250, %223 : vector<2x32xf32>
    %259 = arith.addf %257, %258 : vector<2x32xf32>
    %c12 = arith.constant 12 : index
    %c0_74 = arith.constant 0 : index
    %260 = vector.load %arg10[%c12, %c0_74] : memref<16x32xf32, #tpu.memory_space<vmem>>, vector<2x32xf32>
    tpu.vector_store %arg10[%c12, %c0_74], %259 {strides = array<i32>} : memref<16x32xf32, #tpu.memory_space<vmem>>, vector<2x32xf32>,
    %cst_75 = arith.constant dense<0.000000e+00> : vector<2x768xf32>
    %261 = tpu.matmul %259, %13, %cst_75 {dimension_numbers = #tpu.dot_dimension_numbers<[1], [0], [0], [1], [0, 0, 1, 1], [], []>} : vector<2x32xf32>, vector<32x768xf32>, vector<2x768xf32> -> vector<2x768xf32>
    %262 = arith.addf %261, %12 : vector<2x768xf32>
    %263 = vector.extract_strided_slice %262 {offsets = [0, 384], sizes = [2, 32], strides = [1, 1]} : vector<2x768xf32> to vector<2x32xf32>
    %264 = arith.addf %228, %263 : vector<2x32xf32>
    %265 = vector.extract_strided_slice %262 {offsets = [0, 512], sizes = [2, 32], strides = [1, 1]} : vector<2x768xf32> to vector<2x32xf32>
    %266 = arith.addf %230, %265 : vector<2x32xf32>
    %267 = vector.extract_strided_slice %262 {offsets = [0, 640], sizes = [2, 32], strides = [1, 1]} : vector<2x768xf32> to vector<2x32xf32>
    %268 = arith.addf %232, %267 : vector<2x32xf32>
    %269 = vector.extract_strided_slice %262 {offsets = [0, 0], sizes = [2, 32], strides = [1, 1]} : vector<2x768xf32> to vector<2x32xf32>
    %270 = arith.addf %264, %269 : vector<2x32xf32>
    %cst_76 = arith.constant 5.000000e-01 : f32
    %271 = vector.broadcast %cst_76 : f32 to vector<2x32xf32>
    %272 = arith.mulf %271, %270 : vector<2x32xf32>
    %273 = math.tanh %272 : vector<2x32xf32>
    %cst_77 = arith.constant 5.000000e-01 : f32
    %274 = vector.broadcast %cst_77 : f32 to vector<2x32xf32>
    %275 = arith.mulf %274, %273 : vector<2x32xf32>
    %cst_78 = arith.constant 5.000000e-01 : f32
    %276 = vector.broadcast %cst_78 : f32 to vector<2x32xf32>
    %277 = arith.addf %275, %276 : vector<2x32xf32>
    %278 = vector.extract_strided_slice %262 {offsets = [0, 128], sizes = [2, 32], strides = [1, 1]} : vector<2x768xf32> to vector<2x32xf32>
    %279 = arith.addf %266, %278 : vector<2x32xf32>
    %cst_79 = arith.constant 5.000000e-01 : f32
    %280 = vector.broadcast %cst_79 : f32 to vector<2x32xf32>
    %281 = arith.mulf %280, %279 : vector<2x32xf32>
    %282 = math.tanh %281 : vector<2x32xf32>
    %cst_80 = arith.constant 5.000000e-01 : f32
    %283 = vector.broadcast %cst_80 : f32 to vector<2x32xf32>
    %284 = arith.mulf %283, %282 : vector<2x32xf32>
    %cst_81 = arith.constant 5.000000e-01 : f32
    %285 = vector.broadcast %cst_81 : f32 to vector<2x32xf32>
    %286 = arith.addf %284, %285 : vector<2x32xf32>
    %287 = vector.extract_strided_slice %262 {offsets = [0, 256], sizes = [2, 32], strides = [1, 1]} : vector<2x768xf32> to vector<2x32xf32>
    %288 = arith.mulf %277, %287 : vector<2x32xf32>
    %289 = arith.addf %268, %288 : vector<2x32xf32>
    %290 = math.tanh %289 : vector<2x32xf32>
    %cst_82 = arith.constant 1.000000e+00 : f32
    %291 = vector.broadcast %cst_82 : f32 to vector<2x32xf32>
    %292 = arith.subf %291, %286 : vector<2x32xf32>
    %293 = arith.mulf %292, %290 : vector<2x32xf32>
    %294 = arith.mulf %286, %259 : vector<2x32xf32>
    %295 = arith.addf %293, %294 : vector<2x32xf32>
    %c14 = arith.constant 14 : index
    %c0_83 = arith.constant 0 : index
    %296 = vector.load %arg10[%c14, %c0_83] : memref<16x32xf32, #tpu.memory_space<vmem>>, vector<2x32xf32>
    tpu.vector_store %arg10[%c14, %c0_83], %295 {strides = array<i32>} : memref<16x32xf32, #tpu.memory_space<vmem>>, vector<2x32xf32>,
    %c0_84 = arith.constant 0 : index
    %c0_85 = arith.constant 0 : index
    %297 = vector.load %arg10[%c0_84, %c0_85] : memref<16x32xf32, #tpu.memory_space<vmem>>, vector<16x32xf32>
    %c0_86 = arith.constant 0 : index
    %c0_87 = arith.constant 0 : index
    %298 = vector.load %arg7[%c0_86, %c0_87] : memref<32x128xf32, #tpu.memory_space<vmem>>, vector<32x128xf32>
    %cst_88 = arith.constant dense<0.000000e+00> : vector<16x128xf32>
    %299 = tpu.matmul %297, %298, %cst_88 {dimension_numbers = #tpu.dot_dimension_numbers<[1], [0], [0], [1], [0, 0, 1, 1], [], []>} : vector<16x32xf32>, vector<32x128xf32>, vector<16x128xf32> -> vector<16x128xf32>
    %c0_89 = arith.constant 0 : index
    %c0_90 = arith.constant 0 : index
    %300 = vector.load %arg8[%c0_89, %c0_90] : memref<1x128xf32, #tpu.memory_space<vmem>>, vector<1x128xf32>
    %301 = vector.shape_cast %300 : vector<1x128xf32> to vector<1x128xf32>
    %302 = vector.broadcast %301 : vector<1x128xf32> to vector<16x128xf32>
    %303 = arith.addf %299, %302 : vector<16x128xf32>
    %c0_91 = arith.constant 0 : index
    %c0_92 = arith.constant 0 : index
    %304 = vector.load %arg1[%c0_91, %c0_92] : memref<2x128xf32, #tpu.memory_space<vmem>>, vector<2x128xf32>
    %305 = vector.extract_strided_slice %303 {offsets = [0, 0], sizes = [2, 128], strides = [1, 1]} : vector<16x128xf32> to vector<2x128xf32>
    %306 = arith.addf %304, %305 : vector<2x128xf32>
    %c0_93 = arith.constant 0 : index
    %c0_94 = arith.constant 0 : index
    %307 = vector.load %arg9[%c0_93, %c0_94] : memref<16x128xf32, #tpu.memory_space<vmem>>, vector<2x128xf32>
    tpu.vector_store %arg9[%c0_93, %c0_94], %306 {strides = array<i32>} : memref<16x128xf32, #tpu.memory_space<vmem>>, vector<2x128xf32>,
    %308 = vector.extract_strided_slice %303 {offsets = [2, 0], sizes = [2, 128], strides = [1, 1]} : vector<16x128xf32> to vector<2x128xf32>
    %309 = arith.addf %306, %308 : vector<2x128xf32>
    %c2_95 = arith.constant 2 : index
    %c0_96 = arith.constant 0 : index
    %310 = vector.load %arg9[%c2_95, %c0_96] : memref<16x128xf32, #tpu.memory_space<vmem>>, vector<2x128xf32>
    tpu.vector_store %arg9[%c2_95, %c0_96], %309 {strides = array<i32>} : memref<16x128xf32, #tpu.memory_space<vmem>>, vector<2x128xf32>,
    %311 = vector.extract_strided_slice %303 {offsets = [4, 0], sizes = [2, 128], strides = [1, 1]} : vector<16x128xf32> to vector<2x128xf32>
    %312 = arith.addf %309, %311 : vector<2x128xf32>
    %c4_97 = arith.constant 4 : index
    %c0_98 = arith.constant 0 : index
    %313 = vector.load %arg9[%c4_97, %c0_98] : memref<16x128xf32, #tpu.memory_space<vmem>>, vector<2x128xf32>
    tpu.vector_store %arg9[%c4_97, %c0_98], %312 {strides = array<i32>} : memref<16x128xf32, #tpu.memory_space<vmem>>, vector<2x128xf32>,
    %314 = vector.extract_strided_slice %303 {offsets = [6, 0], sizes = [2, 128], strides = [1, 1]} : vector<16x128xf32> to vector<2x128xf32>
    %315 = arith.addf %312, %314 : vector<2x128xf32>
    %c6_99 = arith.constant 6 : index
    %c0_100 = arith.constant 0 : index
    %316 = vector.load %arg9[%c6_99, %c0_100] : memref<16x128xf32, #tpu.memory_space<vmem>>, vector<2x128xf32>
    tpu.vector_store %arg9[%c6_99, %c0_100], %315 {strides = array<i32>} : memref<16x128xf32, #tpu.memory_space<vmem>>, vector<2x128xf32>,
    %317 = vector.extract_strided_slice %303 {offsets = [8, 0], sizes = [2, 128], strides = [1, 1]} : vector<16x128xf32> to vector<2x128xf32>
    %318 = arith.addf %315, %317 : vector<2x128xf32>
    %c8_101 = arith.constant 8 : index
    %c0_102 = arith.constant 0 : index
    %319 = vector.load %arg9[%c8_101, %c0_102] : memref<16x128xf32, #tpu.memory_space<vmem>>, vector<2x128xf32>
    tpu.vector_store %arg9[%c8_101, %c0_102], %318 {strides = array<i32>} : memref<16x128xf32, #tpu.memory_space<vmem>>, vector<2x128xf32>,
    %320 = vector.extract_strided_slice %303 {offsets = [10, 0], sizes = [2, 128], strides = [1, 1]} : vector<16x128xf32> to vector<2x128xf32>
    %321 = arith.addf %318, %320 : vector<2x128xf32>
    %c10_103 = arith.constant 10 : index
    %c0_104 = arith.constant 0 : index
    %322 = vector.load %arg9[%c10_103, %c0_104] : memref<16x128xf32, #tpu.memory_space<vmem>>, vector<2x128xf32>
    tpu.vector_store %arg9[%c10_103, %c0_104], %321 {strides = array<i32>} : memref<16x128xf32, #tpu.memory_space<vmem>>, vector<2x128xf32>,
    %323 = vector.extract_strided_slice %303 {offsets = [12, 0], sizes = [2, 128], strides = [1, 1]} : vector<16x128xf32> to vector<2x128xf32>
    %324 = arith.addf %321, %323 : vector<2x128xf32>
    %c12_105 = arith.constant 12 : index
    %c0_106 = arith.constant 0 : index
    %325 = vector.load %arg9[%c12_105, %c0_106] : memref<16x128xf32, #tpu.memory_space<vmem>>, vector<2x128xf32>
    tpu.vector_store %arg9[%c12_105, %c0_106], %324 {strides = array<i32>} : memref<16x128xf32, #tpu.memory_space<vmem>>, vector<2x128xf32>,
    %326 = vector.extract_strided_slice %303 {offsets = [14, 0], sizes = [2, 128], strides = [1, 1]} : vector<16x128xf32> to vector<2x128xf32>
    %327 = arith.addf %324, %326 : vector<2x128xf32>
    %c14_107 = arith.constant 14 : index
    %c0_108 = arith.constant 0 : index
    %328 = vector.load %arg9[%c14_107, %c0_108] : memref<16x128xf32, #tpu.memory_space<vmem>>, vector<2x128xf32>
    tpu.vector_store %arg9[%c14_107, %c0_108], %327 {strides = array<i32>} : memref<16x128xf32, #tpu.memory_space<vmem>>, vector<2x128xf32>,
    return
  }
}

</mosaic_0001>

<bundles_post_ra>
// kernel: tpu_custom_call.1
= control target key start
LH: loop header
LB: loop body
LE: loop exit
PB: predicated region body
PF: predicated region fallthrough
CT: control target
= control target key end

     0   :  { %14 = vsyncpa [#allocation4], 0  ;;  %s3171_s0 = inlined_call_operand.hbm [shape: f32[2,32], index: 0, kind: input, shape index: {}]   ;;  %s3172_s1 = inlined_call_operand.vmem [shape: f32[2,128], index: 1, kind: input, shape index: {}]   ;;  %s3173_s2 = inlined_call_operand.hbm [shape: f32[2,4], index: 2, kind: input, shape index: {}]   ;;  %s3174_s3 = inlined_call_operand.hbm [shape: f32[4,384], index: 3, kind: input, shape index: {}]   ;;  %s3175_s4 = inlined_call_operand.vmem [shape: f32[1,384], index: 4, kind: input, shape index: {}]   ;;  %s3176_s5 = inlined_call_operand.hbm [shape: f32[32,768], index: 5, kind: input, shape index: {}]   ;;  %s3177_s6 = inlined_call_operand.vmem [shape: f32[1,768], index: 6, kind: input, shape index: {}]   ;;  %s3178_s7 = inlined_call_operand.hbm [shape: f32[32,128], index: 7, kind: input, shape index: {}]   ;;  %s3179_s8 = inlined_call_operand.vmem [shape: f32[1,128], index: 8, kind: input, shape index: {}]   ;;  %s3180_s9 = inlined_call_operand.hbm [shape: f32[16,128], index: 9, kind: output, shape index: {}]  }
   0x1   :  { %15 = vsyncpa [#allocation7], 0 }
   0x2   :  { %16 = vsyncpa [#allocation10], 0 }
   0x3   :  { %17 = vsyncpa [#allocation5], 0  ;;  %s2742_s30 = smov [#allocation6]   ;;  %s2743_s11 = smov [#allocation9]  }
   0x4   :  { %s36_s10 = sshll.u32 %s2742_s30, 4  ;;  %s57_s12 = sshll.u32 %s2743_s11, 4  ;;  %s37_s10 = int_to_ptr.vmem [resolvable:$true] %s36_s10  ;;  %s2804_s12 = int_to_ptr.vmem [resolvable:$true] %s57_s12 }
   0x5   :  { %s2602_s15 = scalar_lea.hbm %s3173_s2, 32 }
   0x6   :  { %p2603_p0 = scmp.ne.s32.totalorder %s3173_s2, %s2602_s15  ;;  %p2606_p1 = scmp.lt.u32.totalorder %s2602_s15, %s3173_s2 }
   0x8   :  { %p2608_p2 = pnand %p2606_p1, %p2603_p0 }
   0xa   :  { %2611 = shalt.err (!%p2608_p2)
}
   0xb   :  { %s2612_s20 = scalar_lea.vmem %s37_s10, 32  ;;  %p2617_p4 = scmp.lt.s32.totalorder %s37_s10, %s37_s10 }
   0xc   :  { %p2613_p3 = scmp.ne.s32.totalorder %s37_s10, %s2612_s20  ;;  %p2618_p5 = scmp.lt.s32.totalorder %s2612_s20, %s2612_s20 }
   0xe   :  { %p2619_p6 = por %p2618_p5, %p2617_p4 }
  0x10   :  { %p2620_p7 = pnand %p2619_p6, %p2613_p3 }
  0x12   :  { %2623 = shalt.err (!%p2620_p7)
}
  0x13   :  { %39 = dma.hbm_to_vmem [thread:$0]  %s3173_s2, 32, %s37_s10, [#allocation7]  }
  0x14   :  { %s2624_s25 = scalar_lea.hbm %s3176_s5, 3072 }
  0x15   :  { %p2625_p8 = scmp.ne.s32.totalorder %s3176_s5, %s2624_s25  ;;  %p2628_p9 = scmp.lt.u32.totalorder %s2624_s25, %s3176_s5 }
  0x17   :  { %p2630_p10 = pnand %p2628_p9, %p2625_p8 }
  0x19   :  { %2633 = shalt.err (!%p2630_p10)
}
  0x1a   :  { %s2634_s30 = scalar_lea.vmem %s2804_s12, 3072  ;;  %p2639_p12 = scmp.lt.s32.totalorder %s2804_s12, %s2804_s12 }
  0x1b   :  { %p2635_p11 = scmp.ne.s32.totalorder %s2804_s12, %s2634_s30  ;;  %p2640_p13 = scmp.lt.s32.totalorder %s2634_s30, %s2634_s30 }
  0x1d   :  { %p2641_p0 = por %p2640_p13, %p2639_p12 }
  0x1f   :  { %p2642_p1 = pnand %p2641_p0, %p2635_p11 }
  0x21   :  { %2645 = shalt.err (!%p2642_p1)
}
  0x22   :  { %s2744_s2 = smov 768   ;;  %s2745_s10 = smov 48  }
  0x23   :  { %63 = dma.hbm_to_vmem [thread:$0]  %s3176_s5, 3072, %s2804_s12, [#allocation10], %s2744_s2, %s2744_s2, %s2745_s10  }
  0x24   :  { %s2746_s14 = smov [#allocation3]   ;;  %s2747_s16 = smov [#allocation8]  }
  0x25   :  { %s24_s15 = sshll.u32 %s2746_s14, 4  ;;  %s46_s17 = sshll.u32 %s2747_s16, 4  ;;  %s25_s15 = int_to_ptr.vmem [resolvable:$true] %s24_s15  ;;  %s47_s17 = int_to_ptr.vmem [resolvable:$true] %s46_s17 }
  0x26   :  { %s2646_s20 = scalar_lea.hbm %s3171_s0, 32 }
  0x27   :  { %p2647_p2 = scmp.ne.s32.totalorder %s3171_s0, %s2646_s20  ;;  %p2650_p3 = scmp.lt.u32.totalorder %s2646_s20, %s3171_s0 }
  0x29   :  { %p2652_p4 = pnand %p2650_p3, %p2647_p2 }
  0x2b   :  { %2655 = shalt.err (!%p2652_p4)
}
  0x2c   :  { %s2656_s5 = scalar_lea.vmem %s25_s15, 32  ;;  %p2661_p6 = scmp.lt.s32.totalorder %s25_s15, %s25_s15 }
  0x2d   :  { %p2657_p5 = scmp.ne.s32.totalorder %s25_s15, %s2656_s5  ;;  %p2662_p7 = scmp.lt.s32.totalorder %s2656_s5, %s2656_s5 }
  0x2f   :  { %p2663_p8 = por %p2662_p7, %p2661_p6 }
  0x31   :  { %p2664_p9 = pnand %p2663_p8, %p2657_p5 }
  0x33   :  { %2667 = shalt.err (!%p2664_p9)
}
  0x34   :  { %27 = dma.hbm_to_vmem [thread:$0]  %s3171_s0, 32, %s25_s15, [#allocation4]  }
  0x35   :  { %s2668_s28 = scalar_lea.hbm %s3174_s3, 192 }
  0x36   :  { %p2669_p10 = scmp.ne.s32.totalorder %s3174_s3, %s2668_s28  ;;  %p2672_p11 = scmp.lt.u32.totalorder %s2668_s28, %s3174_s3 }
  0x38   :  { %p2674_p12 = pnand %p2672_p11, %p2669_p10 }
  0x3a   :  { %2677 = shalt.err (!%p2674_p12)
}
  0x3b   :  { %s2678_s11 = scalar_lea.vmem %s47_s17, 192  ;;  %p2683_p0 = scmp.lt.s32.totalorder %s47_s17, %s47_s17 }
  0x3c   :  { %p2679_p13 = scmp.ne.s32.totalorder %s47_s17, %s2678_s11  ;;  %p2684_p1 = scmp.lt.s32.totalorder %s2678_s11, %s2678_s11 }
  0x3e   :  { %p2685_p2 = por %p2684_p1, %p2683_p0 }
  0x40   :  { %p2686_p3 = pnand %p2685_p2, %p2679_p13 }
  0x42   :  { %2689 = shalt.err (!%p2686_p3)
}
  0x43   :  { %49 = dma.hbm_to_vmem [thread:$0]  %s3174_s3, 192, %s47_s17, [#allocation7]  }
  0x44   :  { %s2748_s14 = smov [#allocation11]   ;;  %s2690_s19 = scalar_lea.hbm %s3178_s7, 512 }
  0x45   :  { %s71_s15 = sshll.u32 %s2748_s14, 4  ;;  %p2691_p4 = scmp.ne.s32.totalorder %s3178_s7, %s2690_s19  ;;  %s72_s15 = int_to_ptr.vmem [resolvable:$true] %s71_s15 }
  0x46   :  { %p2694_p5 = scmp.lt.u32.totalorder %s2690_s19, %s3178_s7 }
  0x48   :  { %p2696_p6 = pnand %p2694_p5, %p2691_p4 }
  0x4a   :  { %2699 = shalt.err (!%p2696_p6)
}
  0x4b   :  { %s2700_s24 = scalar_lea.vmem %s72_s15, 512  ;;  %p2705_p8 = scmp.lt.s32.totalorder %s72_s15, %s72_s15 }
  0x4c   :  { %p2701_p7 = scmp.ne.s32.totalorder %s72_s15, %s2700_s24  ;;  %p2706_p9 = scmp.lt.s32.totalorder %s2700_s24, %s2700_s24 }
  0x4e   :  { %p2707_p10 = por %p2706_p9, %p2705_p8 }
  0x50   :  { %p2708_p11 = pnand %p2707_p10, %p2701_p7 }
  0x52   :  { %2711 = shalt.err (!%p2708_p11)
}
  0x53   :  { %s2749_s3 = smov 128   ;;  %s2750_s17 = smov 8  }
  0x54   :  { %77 = dma.hbm_to_vmem [thread:$0]  %s3178_s7, 512, %s72_s15, [#allocation10], %s2749_s3, %s2749_s3, %s2750_s17  }
  0x55   :  { %2734 = dma.done.wait [#allocation4], 32  }
  0x56   :  { %2735 = vsyncadd [#allocation4], 4294967264 }
  0x57   :  { %2736 = dma.done.wait [#allocation7], 224  }
  0x58   :  { %2737 = vsyncadd [#allocation7], 4294967072 }
  0x59   :  { %2738 = dma.done.wait [#allocation10], 3584  }
  0x5a   :  { %2739 = vsyncadd [#allocation10], 4294963712  ;;  %v2751_v0 = vmov 0.0   ;;  %vm2752_vm0 = vmmov 0   ;;  %v96_v1 = vld [vmem:[#allocation8] sm:$0xff]  ;;  %vm122_vm1 = vcmask 1043456   ;;  %v100_v33 = vlaneseq }
  0x5b   :  { %193 = vmatprep.mubr.f32.mxu0 %v2751_v0  ;;  %2333 = vmatprep.subr.mxu1 %v2751_v0  ;;  %v303_v2 = vld [vmem:[#allocation9 + $0x8] sm:$0xff]  ;;  %v117_v3 = vcombine.high %v96_v1, %v96_v1  ;;  %v309_v4 = vld [vmem:[#allocation9 + $0x38] sm:$0xff]  ;;  %v302_v5 = vld [vmem:[#allocation9] sm:$0xff]  ;;  %vm118_vm2 = vcmask 31744   ;;  %vm327_vm3 = vcmask 261120   ;;  %vm489_vm4 = vcmask 254976  }
  0x5c   :  { %2335 = vmatprep.mubr.msk.f32.mxu1 %vm2752_vm0, %v2751_v0  ;;  %v308_v6 = vld [vmem:[#allocation9 + $0x30] sm:$0xff]  ;;  %v2877_v8 = vpack.c.bf16 %v309_v4, %v303_v2  ;;  %v315_v10 = vld [vmem:[#allocation9 + $0x68] sm:$0xff]  ;;  %v321_v11 = vld [vmem:[#allocation9 + $0x98] sm:$0xff]  ;;  %v2928_v34 = vshrl.u32 %v100_v33, 7 }
  0x5d   :  { %v95_v7 = vld [vmem:[#allocation6] sm:$0x3]  ;;  %v2879_v9 = vpack.c.bf16 %v308_v6, %v302_v5  ;;  %2294 = vmatprep.subr.msk.mxu0 %vm122_vm1, %v117_v3  ;;  %v2882_v12 = vpack.c.bf16 %v321_v11, %v315_v10  ;;  %v314_v13 = vld [vmem:[#allocation9 + $0x60] sm:$0xff]  ;;  %v97_v15 = vld [vmem:[#allocation8 + $0x8] sm:$0xf] }
  0x5e   :  { %v320_v14 = vld [vmem:[#allocation9 + $0x90] sm:$0xff]  ;;  %2295 = vmatpush1.msk.msra.mxu0 %vm122_vm1, %v96_v1  ;;  %2334 = vmatpush3.msk.msra.mxu1 %vm122_vm1, %v97_v15  ;;  %v305_v16 = vld [vmem:[#allocation9 + $0x18] sm:$0xff]  ;;  %v311_v17 = vld [vmem:[#allocation9 + $0x48] sm:$0xff]  ;;  %v102_v36 = vsub.s32 0, %v2928_v34  ;;  %v106_v41 = vsub.s32 1, %v2928_v34  ;;  %v110_v59 = vsub.s32 2, %v2928_v34 }
  0x5f   :  { %v304_v18 = vld [vmem:[#allocation9 + $0x10] sm:$0xff]  ;;  %2296 = vmatmul.mubr.msk.f32.vlgmr.msra.gmra.mrb[0].mxu0 %vm118_vm2, %v95_v7  ;;  %2350 = vmatprep.subr.bf16.mxu0 %v2877_v8  ;;  %v2888_v19 = vpack.c.bf16 %v311_v17, %v305_v16  ;;  %v310_v20 = vld [vmem:[#allocation9 + $0x40] sm:$0xff]  ;;  %v317_v21 = vld [vmem:[#allocation9 + $0x78] sm:$0xff]  ;;  %v2891_v23 = vpack.c.bf16 %v320_v14, %v314_v13 }
  0x60   :  { %v323_v22 = vld [vmem:[#allocation9 + $0xa8] sm:$0xff]  ;;  %2352 = vmatpush1.bf16.msra.mxu0 %v2879_v9  ;;  %395 = vmatprep.mubr.f32.mxu0 %v2751_v0  ;;  %v2894_v24 = vpack.c.bf16 %v310_v20, %v304_v18  ;;  %v316_v26 = vld [vmem:[#allocation9 + $0x70] sm:$0xff]  ;;  %v322_v27 = vld [vmem:[#allocation9 + $0xa0] sm:$0xff] }
  0x61   :  { %v2896_v25 = vpack.c.bf16 %v323_v22, %v317_v21  ;;  %2354 = vmatprep.subr.bf16.mxu0 %v2882_v12  ;;  %2358 = vmatprep.subr.bf16.mxu1 %v2888_v19  ;;  %v2902_v28 = vpack.c.bf16 %v322_v27, %v316_v26  ;;  %v2906_v29 = vld [vmem:[#allocation3] sm:$0x3]  ;;  %v307_v30 = vld [vmem:[#allocation9 + $0x28] sm:$0xff]  ;;  %v313_v31 = vld [vmem:[#allocation9 + $0x58] sm:$0xff] }
  0x62   :  { %2336 = vmatmul.mubr.msk.f32.vlgmr.msra.gmra.mrb[0].mxu1 %vm118_vm2, %v95_v7  ;;  %v2925_v32 = vpack.c.bf16 %v313_v31, %v307_v30  ;;  %v98_v38 = vld [vmem:[%s3175_s4] sm:$0x7]  ;;  %v306_v13 = vld [vmem:[#allocation9 + $0x20] sm:$0xff]  ;;  %v319_v16 = vld [vmem:[#allocation9 + $0x88] sm:$0xff] }
  0x63   :  { %2360 = vmatpush1.bf16.msra.mxu1 %v2894_v24  ;;  %466 = vmatprep.mubr.f32.mxu1 %v2751_v0  ;;  %v2937_v39 = vld [vmem:[%s3177_s6] sm:$0x3f]  ;;  %v103_v43 = vrot.slane %v98_v38, %v102_v36  ;;  %v107_v46 = vrot.slane %v98_v38, %v106_v41  ;;  %v111_v62 = vrot.slane %v98_v38, %v110_v59  ;;  %v325_v17 = vld [vmem:[#allocation9 + $0xb8] sm:$0xff]  ;;  %v318_v27 = vld [vmem:[#allocation9 + $0x80] sm:$0xff] }
  0x64   :  { %2356 = vmatpush1.bf16.msra.mxu0 %v2891_v23  ;;  %2362 = vmatprep.subr.bf16.mxu1 %v2896_v25  ;;  %v2941_v44 = vrot.slane %v2937_v39, %v102_v36  ;;  %v2944_v45 = vrot.slane %v2937_v39, %v106_v41  ;;  %v2956_v60 = vrot.slane %v2937_v39, %v110_v59  ;;  %v312_v14 = vld [vmem:[#allocation9 + $0x50] sm:$0xff] }
  0x65   :  { %2366 = vmatprep.subr.bf16.mxu0 %v2877_v8  ;;  %v2963_v21 = vpack.c.bf16 %v312_v14, %v306_v13  ;;  %v2965_v26 = vpack.c.bf16 %v325_v17, %v319_v16  ;;  %v324_v30 = vld [vmem:[#allocation9 + $0xb0] sm:$0xff] }
  0x66   :  { %v2971_v31 = vpack.c.bf16 %v324_v30, %v318_v27 }
  0x67   :  { %2299 = vmatmul.mubr.msk.f32.vlgmr.msra.gmra.mrb[2].mxu0 %vm327_vm3, %v2906_v29  ;;  %2364 = vmatpush1.bf16.msra.mxu1 %v2902_v28 }
  0x68   :  { %2368 = vmatpush1.bf16.msra.mxu0 %v2879_v9  ;;  %2374 = vmatprep.subr.bf16.mxu1 %v2888_v19 }
  0x69   :  { %2370 = vmatprep.subr.bf16.mxu0 %v2882_v12  ;;  %558 = vmatprep.mubr.f32.mxu0 %v2751_v0 }
  0x6a   :  { %2300 = vmatmul.mubr.msk.f32.vlgmr.msra.gmra.mrb[2].mxu1 %vm327_vm3, %v2906_v29 }
  0x6b   :  { %2376 = vmatpush1.bf16.msra.mxu1 %v2894_v24  ;;  %629 = vmatprep.mubr.f32.mxu1 %v2751_v0 }
  0x6c   :  { %2372 = vmatpush1.bf16.msra.mxu0 %v2891_v23  ;;  %2378 = vmatprep.subr.bf16.mxu1 %v2896_v25 }
  0x6d   :  { %2382 = vmatprep.subr.bf16.mxu0 %v2925_v32 }
  0x6f   :  { %2380 = vmatpush1.bf16.msra.mxu1 %v2902_v28 }
  0x70   :  { %2390 = vmatprep.subr.bf16.mxu1 %v2877_v8 }
 0x132   :  { %v195_v35 = vpop.f32.mrb[0].mxu0 }
 0x133   :  { %v197_v37 = vpop.f32.mrb[1].mxu0  ;;  %v2946_v48 = vadd.f32 %v195_v35, %v103_v43 }
 0x134   :  { %v2951_v54 = vadd.f32 %v197_v37, %v107_v46  ;;  %v290_v37 = vsub.s32 4, %v2928_v34 }
 0x135   :  { %v266_v40 = vpop.f32.mrb[0].mxu1 }
 0x136   :  { %v2337_v42 = vpop.f32.mrb[1].mxu1  ;;  %v2959_v3 = vadd.f32 %v266_v40, %v111_v62  ;;  %v2997_v46 = vrot.slane %v2937_v39, %v290_v37 }
 0x13a   :  { %v397_v47 = vpop.f32.mrb[2].mxu0 }
 0x13b   :  { %v398_v49 = vadd.f32 %v397_v47, %v2941_v44  ;;  %v399_v50 = vpop.f32.mrb[3].mxu0 }
 0x13c   :  { %v400_v51 = vadd.f32 %v399_v50, %v2944_v45 }
 0x13d   :  { %v472_v52 = vadd.f32 %v398_v49, %v2946_v48  ;;  %v468_v53 = vpop.f32.mrb[2].mxu1 }
 0x13e   :  { %v470_v55 = vpop.f32.mrb[3].mxu1  ;;  %v477_v57 = vadd.f32 %v400_v51, %v2951_v54  ;;  %v469_v63 = vadd.f32 %v468_v53, %v2956_v60 }
 0x13f   :  { %v473_v56 = vmul.f32 0.5, %v472_v52 }
 0x140   :  { %v478_v58 = vmul.f32 0.5, %v477_v57 }
 0x141   :  { %2554 = vtanh.f32 %v473_v56  ;;  %v294_v56 = vsub.s32 5, %v2928_v34 }
 0x142   :  { %2556 = vtanh.f32 %v478_v58 }
 0x14b   :  { %v2555_v61 = vpop.eup %2554 }
 0x14c   :  { %v475_v1 = vmul.f32 0.5, %v2555_v61  ;;  %v2557_v5 = vpop.eup %2556 }
 0x14d   :  { %v480_v7 = vmul.f32 0.5, %v2557_v5 }
 0x14e   :  { %v476_v2 = vadd.f32 0.5, %v475_v1 }
 0x14f   :  { %v481_v10 = vadd.f32 0.5, %v480_v7 }
 0x150   :  { %v482_v4 = vmul.f32 %v476_v2, %v469_v63 }
 0x151   :  { %v485_v11 = vsub.f32 1.0, %v481_v10  ;;  %v487_v18 = vmul.f32 %v481_v10, %v2906_v29  ;;  %v286_v29 = vsub.s32 3, %v2928_v34 }
 0x152   :  { %v483_v6 = vadd.f32 %v482_v4, %v2959_v3 }
 0x153   :  { %v2990_v33 = vrot.slane %v2937_v39, %v286_v29 }
 0x154   :  { %2558 = vtanh.f32 %v483_v6 }
 0x15e   :  { %v2559_v15 = vpop.eup %2558 }
 0x15f   :  { %v486_v20 = vmul.f32 %v2559_v15, %v485_v11 }
 0x161   :  { %v488_v22 = vadd.f32 %v487_v18, %v486_v20 }
 0x163   :  { %490 = vst.msk [vmem:[#allocation2] sm:$0x3] %vm489_vm4, %v488_v22  ;;  %2301 = vmatmul.mubr.msk.f32.vlgmr.msra.gmra.mrb[4].mxu0 %vm327_vm3, %v488_v22  ;;  %2302 = vmatmul.mubr.msk.f32.vlgmr.msra.gmra.mrb[4].mxu1 %vm327_vm3, %v488_v22 }
 0x164   :  { %2384 = vmatpush1.bf16.msra.mxu0 %v2963_v21  ;;  %700 = vmatprep.mubr.f32.mxu0 %v2751_v0 }
 0x165   :  { %2386 = vmatprep.subr.bf16.mxu0 %v2965_v26  ;;  %2392 = vmatpush1.bf16.msra.mxu1 %v2879_v9 }
 0x166   :  { %2394 = vmatprep.subr.bf16.mxu1 %v2882_v12  ;;  %795 = vmatprep.mubr.f32.mxu1 %v2751_v0 }
 0x168   :  { %2388 = vmatpush1.bf16.msra.mxu0 %v2971_v31 }
 0x169   :  { %2398 = vmatprep.subr.bf16.mxu0 %v2888_v19  ;;  %2396 = vmatpush1.bf16.msra.mxu1 %v2891_v23 }
 0x16a   :  { %2406 = vmatprep.subr.bf16.mxu1 %v2925_v32 }
 0x16b   :  { %2303 = vmatmul.mubr.msk.f32.vlgmr.msra.gmra.mrb[6].mxu0 %vm327_vm3, %v488_v22 }
 0x16c   :  { %2400 = vmatpush1.bf16.msra.mxu0 %v2894_v24  ;;  %866 = vmatprep.mubr.f32.mxu0 %v2751_v0 }
 0x16d   :  { %2402 = vmatprep.subr.bf16.mxu0 %v2896_v25 }
 0x170   :  { %2404 = vmatpush1.bf16.msra.mxu0 %v2902_v28 }
 0x171   :  { %2414 = vmatprep.subr.bf16.mxu0 %v2877_v8 }
 0x236   :  { %v560_v35 = vpop.f32.mrb[4].mxu0  ;;  %v631_v36 = vpop.f32.mrb[4].mxu1 }
 0x237   :  { %v562_v38 = vpop.f32.mrb[5].mxu0  ;;  %v633_v40 = vpop.f32.mrb[5].mxu1  ;;  %v561_v42 = vadd.f32 %v560_v35, %v2941_v44  ;;  %v632_v63 = vadd.f32 %v631_v36, %v2956_v60 }
 0x238   :  { %v634_v41 = vadd.f32 %v633_v40, %v2990_v33  ;;  %v563_v53 = vadd.f32 %v562_v38, %v2944_v45 }
 0x23a   :  { %v707_v43 = vadd.f32 %v634_v41, %v2946_v48  ;;  %v3004_v48 = vrot.slane %v2937_v39, %v294_v56 }
 0x23c   :  { %v710_v47 = vadd.f32 %v707_v43, %v561_v42 }
 0x23e   :  { %v711_v49 = vmul.f32 0.5, %v710_v47  ;;  %v702_v50 = vpop.f32.mrb[6].mxu0 }
 0x23f   :  { %v703_v51 = vadd.f32 %v702_v50, %v2997_v46  ;;  %v704_v52 = vpop.f32.mrb[7].mxu0 }
 0x240   :  { %2560 = vtanh.f32 %v711_v49  ;;  %v705_v62 = vadd.f32 %v704_v52, %v3004_v48 }
 0x241   :  { %v708_v55 = vadd.f32 %v703_v51, %v2951_v54 }
 0x242   :  { %v709_v2 = vadd.f32 %v705_v62, %v2959_v3 }
 0x243   :  { %v715_v57 = vadd.f32 %v708_v55, %v563_v53 }
 0x245   :  { %v716_v58 = vmul.f32 0.5, %v715_v57 }
 0x247   :  { %2562 = vtanh.f32 %v716_v58 }
 0x24a   :  { %v2561_v59 = vpop.eup %2560 }
 0x24b   :  { %v713_v61 = vmul.f32 0.5, %v2561_v59 }
 0x24d   :  { %v714_v1 = vadd.f32 0.5, %v713_v61 }
 0x24f   :  { %v720_v4 = vmul.f32 %v714_v1, %v632_v63 }
 0x251   :  { %v2563_v5 = vpop.eup %2562  ;;  %v721_v54 = vadd.f32 %v720_v4, %v709_v2 }
 0x252   :  { %v718_v34 = vmul.f32 0.5, %v2563_v5 }
 0x253   :  { %2564 = vtanh.f32 %v721_v54 }
 0x254   :  { %v719_v6 = vadd.f32 0.5, %v718_v34 }
 0x256   :  { %v723_v7 = vsub.f32 1.0, %v719_v6  ;;  %v725_v39 = vmul.f32 %v719_v6, %v488_v22 }
 0x25d   :  { %v2565_v10 = vpop.eup %2564 }
 0x25e   :  { %v724_v11 = vmul.f32 %v2565_v10, %v723_v7 }
 0x260   :  { %v726_v13 = vadd.f32 %v725_v39, %v724_v11 }
 0x262   :  { %727 = vst.msk [vmem:[#allocation2 + $0x2] sm:$0x3] %vm489_vm4, %v726_v13  ;;  %2304 = vmatmul.mubr.msk.f32.vlgmr.msra.gmra.mrb[6].mxu1 %vm327_vm3, %v726_v13  ;;  %2305 = vmatmul.mubr.msk.f32.vlgmr.msra.gmra.mrb[8].mxu0 %vm327_vm3, %v726_v13 }
 0x263   :  { %2408 = vmatpush1.bf16.msra.mxu1 %v2963_v21  ;;  %937 = vmatprep.mubr.f32.mxu1 %v2751_v0 }
 0x264   :  { %2410 = vmatprep.subr.bf16.mxu1 %v2965_v26  ;;  %2416 = vmatpush1.bf16.msra.mxu0 %v2879_v9 }
 0x265   :  { %2418 = vmatprep.subr.bf16.mxu0 %v2882_v12  ;;  %1032 = vmatprep.mubr.f32.mxu0 %v2751_v0 }
 0x267   :  { %2412 = vmatpush1.bf16.msra.mxu1 %v2971_v31 }
 0x268   :  { %2422 = vmatprep.subr.bf16.mxu1 %v2888_v19  ;;  %2420 = vmatpush1.bf16.msra.mxu0 %v2891_v23 }
 0x269   :  { %2430 = vmatprep.subr.bf16.mxu0 %v2925_v32 }
 0x26a   :  { %2306 = vmatmul.mubr.msk.f32.vlgmr.msra.gmra.mrb[8].mxu1 %vm327_vm3, %v726_v13 }
 0x26b   :  { %2424 = vmatpush1.bf16.msra.mxu1 %v2894_v24  ;;  %1103 = vmatprep.mubr.f32.mxu1 %v2751_v0 }
 0x26c   :  { %2426 = vmatprep.subr.bf16.mxu1 %v2896_v25 }
 0x26f   :  { %2428 = vmatpush1.bf16.msra.mxu1 %v2902_v28 }
 0x270   :  { %2438 = vmatprep.subr.bf16.mxu1 %v2877_v8 }
 0x335   :  { %v797_v3 = vpop.f32.mrb[6].mxu1  ;;  %v868_v14 = vpop.f32.mrb[8].mxu0 }
 0x336   :  { %v799_v15 = vpop.f32.mrb[7].mxu1  ;;  %v870_v16 = vpop.f32.mrb[9].mxu0  ;;  %v798_v18 = vadd.f32 %v797_v3, %v2941_v44  ;;  %v869_v49 = vadd.f32 %v868_v14, %v2956_v60 }
 0x337   :  { %v871_v17 = vadd.f32 %v870_v16, %v2990_v33  ;;  %v800_v36 = vadd.f32 %v799_v15, %v2944_v45 }
 0x339   :  { %v944_v20 = vadd.f32 %v871_v17, %v707_v43 }
 0x33b   :  { %v947_v22 = vadd.f32 %v944_v20, %v798_v18 }
 0x33d   :  { %v948_v27 = vmul.f32 0.5, %v947_v22  ;;  %v939_v30 = vpop.f32.mrb[8].mxu1 }
 0x33e   :  { %v940_v29 = vadd.f32 %v939_v30, %v2997_v46  ;;  %v941_v35 = vpop.f32.mrb[9].mxu1 }
 0x33f   :  { %2566 = vtanh.f32 %v948_v27  ;;  %v942_v47 = vadd.f32 %v941_v35, %v3004_v48 }
 0x340   :  { %v945_v37 = vadd.f32 %v940_v29, %v708_v55 }
 0x341   :  { %v946_v50 = vadd.f32 %v942_v47, %v709_v2 }
 0x342   :  { %v952_v38 = vadd.f32 %v945_v37, %v800_v36 }
 0x344   :  { %v953_v40 = vmul.f32 0.5, %v952_v38 }
 0x346   :  { %2568 = vtanh.f32 %v953_v40 }
 0x349   :  { %v2567_v41 = vpop.eup %2566 }
 0x34a   :  { %v950_v42 = vmul.f32 0.5, %v2567_v41 }
 0x34c   :  { %v951_v43 = vadd.f32 0.5, %v950_v42 }
 0x34e   :  { %v957_v51 = vmul.f32 %v951_v43, %v869_v49 }
 0x350   :  { %v2569_v52 = vpop.eup %2568  ;;  %v958_v53 = vadd.f32 %v957_v51, %v946_v50 }
 0x351   :  { %v955_v56 = vmul.f32 0.5, %v2569_v52 }
 0x352   :  { %2570 = vtanh.f32 %v958_v53 }
 0x353   :  { %v956_v57 = vadd.f32 0.5, %v955_v56 }
 0x355   :  { %v960_v58 = vsub.f32 1.0, %v956_v57  ;;  %v962_v55 = vmul.f32 %v956_v57, %v726_v13 }
 0x35c   :  { %v2571_v59 = vpop.eup %2570 }
 0x35d   :  { %v961_v61 = vmul.f32 %v2571_v59, %v960_v58 }
 0x35f   :  { %v963_v62 = vadd.f32 %v962_v55, %v961_v61 }
 0x361   :  { %964 = vst.msk [vmem:[#allocation2 + $0x4] sm:$0x3] %vm489_vm4, %v963_v62  ;;  %2307 = vmatmul.mubr.msk.f32.vlgmr.msra.gmra.mrb[10].mxu0 %vm327_vm3, %v963_v62  ;;  %2308 = vmatmul.mubr.msk.f32.vlgmr.msra.gmra.mrb[10].mxu1 %vm327_vm3, %v963_v62 }
 0x362   :  { %2432 = vmatpush1.bf16.msra.mxu0 %v2963_v21  ;;  %1174 = vmatprep.mubr.f32.mxu0 %v2751_v0 }
 0x363   :  { %2434 = vmatprep.subr.bf16.mxu0 %v2965_v26  ;;  %2440 = vmatpush1.bf16.msra.mxu1 %v2879_v9 }
 0x364   :  { %2442 = vmatprep.subr.bf16.mxu1 %v2882_v12  ;;  %1269 = vmatprep.mubr.f32.mxu1 %v2751_v0 }
 0x366   :  { %2436 = vmatpush1.bf16.msra.mxu0 %v2971_v31 }
 0x367   :  { %2446 = vmatprep.subr.bf16.mxu0 %v2888_v19  ;;  %2444 = vmatpush1.bf16.msra.mxu1 %v2891_v23 }
 0x368   :  { %2454 = vmatprep.subr.bf16.mxu1 %v2925_v32 }
 0x369   :  { %2309 = vmatmul.mubr.msk.f32.vlgmr.msra.gmra.mrb[12].mxu0 %vm327_vm3, %v963_v62 }
 0x36a   :  { %2448 = vmatpush1.bf16.msra.mxu0 %v2894_v24  ;;  %1340 = vmatprep.mubr.f32.mxu0 %v2751_v0 }
 0x36b   :  { %2450 = vmatprep.subr.bf16.mxu0 %v2896_v25 }
 0x36e   :  { %2452 = vmatpush1.bf16.msra.mxu0 %v2902_v28 }
 0x36f   :  { %2462 = vmatprep.subr.bf16.mxu0 %v2877_v8 }
 0x434   :  { %v1034_v63 = vpop.f32.mrb[10].mxu0  ;;  %v1105_v1 = vpop.f32.mrb[10].mxu1 }
 0x435   :  { %v1036_v2 = vpop.f32.mrb[11].mxu0  ;;  %v1107_v4 = vpop.f32.mrb[11].mxu1  ;;  %v1035_v54 = vadd.f32 %v1034_v63, %v2941_v44  ;;  %v1106_v22 = vadd.f32 %v1105_v1, %v2956_v60 }
 0x436   :  { %v1108_v5 = vadd.f32 %v1107_v4, %v2990_v33  ;;  %v1037_v13 = vadd.f32 %v1036_v2, %v2944_v45 }
 0x438   :  { %v1181_v34 = vadd.f32 %v1108_v5, %v944_v20 }
 0x43a   :  { %v1184_v6 = vadd.f32 %v1181_v34, %v1035_v54 }
 0x43c   :  { %v1185_v7 = vmul.f32 0.5, %v1184_v6  ;;  %v1176_v10 = vpop.f32.mrb[12].mxu0 }
 0x43d   :  { %v1177_v39 = vadd.f32 %v1176_v10, %v2997_v46  ;;  %v1178_v11 = vpop.f32.mrb[13].mxu0 }
 0x43e   :  { %2572 = vtanh.f32 %v1185_v7  ;;  %v1179_v18 = vadd.f32 %v1178_v11, %v3004_v48 }
 0x43f   :  { %v1182_v3 = vadd.f32 %v1177_v39, %v945_v37 }
 0x440   :  { %v1183_v27 = vadd.f32 %v1179_v18, %v946_v50 }
 0x441   :  { %v1189_v14 = vadd.f32 %v1182_v3, %v1037_v13 }
 0x443   :  { %v1190_v15 = vmul.f32 0.5, %v1189_v14 }
 0x445   :  { %2574 = vtanh.f32 %v1190_v15 }
 0x448   :  { %v2573_v16 = vpop.eup %2572 }
 0x449   :  { %v1187_v17 = vmul.f32 0.5, %v2573_v16 }
 0x44b   :  { %v1188_v20 = vadd.f32 0.5, %v1187_v17 }
 0x44d   :  { %v1194_v30 = vmul.f32 %v1188_v20, %v1106_v22 }
 0x44f   :  { %v2575_v29 = vpop.eup %2574  ;;  %v1195_v35 = vadd.f32 %v1194_v30, %v1183_v27 }
 0x450   :  { %v1192_v36 = vmul.f32 0.5, %v2575_v29 }
 0x451   :  { %2576 = vtanh.f32 %v1195_v35 }
 0x452   :  { %v1193_v38 = vadd.f32 0.5, %v1192_v36 }
 0x454   :  { %v1197_v40 = vsub.f32 1.0, %v1193_v38  ;;  %v1199_v37 = vmul.f32 %v1193_v38, %v963_v62 }
 0x45b   :  { %v2577_v41 = vpop.eup %2576 }
 0x45c   :  { %v1198_v42 = vmul.f32 %v2577_v41, %v1197_v40 }
 0x45e   :  { %v1200_v47 = vadd.f32 %v1199_v37, %v1198_v42 }
 0x460   :  { %1201 = vst.msk [vmem:[#allocation2 + $0x6] sm:$0x3] %vm489_vm4, %v1200_v47  ;;  %2310 = vmatmul.mubr.msk.f32.vlgmr.msra.gmra.mrb[12].mxu1 %vm327_vm3, %v1200_v47  ;;  %2311 = vmatmul.mubr.msk.f32.vlgmr.msra.gmra.mrb[14].mxu0 %vm327_vm3, %v1200_v47 }
 0x461   :  { %2456 = vmatpush1.bf16.msra.mxu1 %v2963_v21  ;;  %1411 = vmatprep.mubr.f32.mxu1 %v2751_v0 }
 0x462   :  { %2458 = vmatprep.subr.bf16.mxu1 %v2965_v26  ;;  %2464 = vmatpush1.bf16.msra.mxu0 %v2879_v9 }
 0x463   :  { %2466 = vmatprep.subr.bf16.mxu0 %v2882_v12  ;;  %1506 = vmatprep.mubr.f32.mxu0 %v2751_v0 }
 0x465   :  { %2460 = vmatpush1.bf16.msra.mxu1 %v2971_v31 }
 0x466   :  { %2470 = vmatprep.subr.bf16.mxu1 %v2888_v19  ;;  %2468 = vmatpush1.bf16.msra.mxu0 %v2891_v23 }
 0x467   :  { %2478 = vmatprep.subr.bf16.mxu0 %v2925_v32 }
 0x468   :  { %2312 = vmatmul.mubr.msk.f32.vlgmr.msra.gmra.mrb[14].mxu1 %vm327_vm3, %v1200_v47 }
 0x469   :  { %2472 = vmatpush1.bf16.msra.mxu1 %v2894_v24  ;;  %1577 = vmatprep.mubr.f32.mxu1 %v2751_v0 }
 0x46a   :  { %2474 = vmatprep.subr.bf16.mxu1 %v2896_v25 }
 0x46d   :  { %2476 = vmatpush1.bf16.msra.mxu1 %v2902_v28 }
 0x46e   :  { %2486 = vmatprep.subr.bf16.mxu1 %v2877_v8 }
 0x533   :  { %v1271_v49 = vpop.f32.mrb[12].mxu1  ;;  %v1342_v43 = vpop.f32.mrb[14].mxu0 }
 0x534   :  { %v1273_v50 = vpop.f32.mrb[13].mxu1  ;;  %v1344_v51 = vpop.f32.mrb[15].mxu0  ;;  %v1272_v53 = vadd.f32 %v1271_v49, %v2941_v44  ;;  %v1343_v6 = vadd.f32 %v1342_v43, %v2956_v60 }
 0x535   :  { %v1345_v52 = vadd.f32 %v1344_v51, %v2990_v33  ;;  %v1274_v62 = vadd.f32 %v1273_v50, %v2944_v45 }
 0x537   :  { %v1418_v56 = vadd.f32 %v1345_v52, %v1181_v34 }
 0x539   :  { %v1421_v57 = vadd.f32 %v1418_v56, %v1272_v53 }
 0x53b   :  { %v1422_v58 = vmul.f32 0.5, %v1421_v57  ;;  %v1413_v59 = vpop.f32.mrb[14].mxu1 }
 0x53c   :  { %v1414_v55 = vadd.f32 %v1413_v59, %v2997_v46  ;;  %v1415_v61 = vpop.f32.mrb[15].mxu1 }
 0x53d   :  { %2578 = vtanh.f32 %v1422_v58  ;;  %v1416_v54 = vadd.f32 %v1415_v61, %v3004_v48 }
 0x53e   :  { %v1419_v63 = vadd.f32 %v1414_v55, %v1182_v3 }
 0x53f   :  { %v1420_v7 = vadd.f32 %v1416_v54, %v1183_v27 }
 0x540   :  { %v1426_v1 = vadd.f32 %v1419_v63, %v1274_v62 }
 0x542   :  { %v1427_v2 = vmul.f32 0.5, %v1426_v1 }
 0x544   :  { %2580 = vtanh.f32 %v1427_v2 }
 0x547   :  { %v2579_v4 = vpop.eup %2578 }
 0x548   :  { %v1424_v5 = vmul.f32 0.5, %v2579_v4 }
 0x54a   :  { %v1425_v34 = vadd.f32 0.5, %v1424_v5 }
 0x54c   :  { %v1431_v10 = vmul.f32 %v1425_v34, %v1343_v6 }
 0x54e   :  { %v2581_v39 = vpop.eup %2580  ;;  %v1432_v11 = vadd.f32 %v1431_v10, %v1420_v7 }
 0x54f   :  { %v1429_v13 = vmul.f32 0.5, %v2581_v39 }
 0x550   :  { %2582 = vtanh.f32 %v1432_v11 }
 0x551   :  { %v1430_v14 = vadd.f32 0.5, %v1429_v13 }
 0x553   :  { %v1434_v15 = vsub.f32 1.0, %v1430_v14  ;;  %v1436_v3 = vmul.f32 %v1430_v14, %v1200_v47 }
 0x55a   :  { %v2583_v16 = vpop.eup %2582 }
 0x55b   :  { %v1435_v17 = vmul.f32 %v2583_v16, %v1434_v15 }
 0x55d   :  { %v1437_v18 = vadd.f32 %v1436_v3, %v1435_v17 }
 0x55f   :  { %1438 = vst.msk [vmem:[#allocation2 + $0x8] sm:$0x3] %vm489_vm4, %v1437_v18  ;;  %2313 = vmatmul.mubr.msk.f32.vlgmr.msra.gmra.mrb[16].mxu0 %vm327_vm3, %v1437_v18  ;;  %2314 = vmatmul.mubr.msk.f32.vlgmr.msra.gmra.mrb[16].mxu1 %vm327_vm3, %v1437_v18 }
 0x560   :  { %2480 = vmatpush1.bf16.msra.mxu0 %v2963_v21  ;;  %1648 = vmatprep.mubr.f32.mxu0 %v2751_v0 }
 0x561   :  { %2482 = vmatprep.subr.bf16.mxu0 %v2965_v26  ;;  %2488 = vmatpush1.bf16.msra.mxu1 %v2879_v9 }
 0x562   :  { %2490 = vmatprep.subr.bf16.mxu1 %v2882_v12  ;;  %1743 = vmatprep.mubr.f32.mxu1 %v2751_v0 }
 0x564   :  { %2484 = vmatpush1.bf16.msra.mxu0 %v2971_v31 }
 0x565   :  { %2494 = vmatprep.subr.bf16.mxu0 %v2888_v19  ;;  %2492 = vmatpush1.bf16.msra.mxu1 %v2891_v23 }
 0x566   :  { %2502 = vmatprep.subr.bf16.mxu1 %v2925_v32 }
 0x567   :  { %2315 = vmatmul.mubr.msk.f32.vlgmr.msra.gmra.mrb[18].mxu0 %vm327_vm3, %v1437_v18 }
 0x568   :  { %2496 = vmatpush1.bf16.msra.mxu0 %v2894_v24  ;;  %1814 = vmatprep.mubr.f32.mxu0 %v2751_v0 }
 0x569   :  { %2498 = vmatprep.subr.bf16.mxu0 %v2896_v25 }
 0x56c   :  { %2500 = vmatpush1.bf16.msra.mxu0 %v2902_v28 }
 0x56d   :  { %2510 = vmatprep.subr.bf16.mxu0 %v2877_v8 }
 0x632   :  { %v1508_v22 = vpop.f32.mrb[16].mxu0  ;;  %v1579_v20 = vpop.f32.mrb[16].mxu1 }
 0x633   :  { %v1510_v27 = vpop.f32.mrb[17].mxu0  ;;  %v1581_v30 = vpop.f32.mrb[17].mxu1  ;;  %v1509_v35 = vadd.f32 %v1508_v22, %v2941_v44  ;;  %v1580_v53 = vadd.f32 %v1579_v20, %v2956_v60 }
 0x634   :  { %v1582_v29 = vadd.f32 %v1581_v30, %v2990_v33  ;;  %v1511_v47 = vadd.f32 %v1510_v27, %v2944_v45 }
 0x636   :  { %v1655_v36 = vadd.f32 %v1582_v29, %v1418_v56 }
 0x638   :  { %v1658_v38 = vadd.f32 %v1655_v36, %v1509_v35 }
 0x63a   :  { %v1659_v40 = vmul.f32 0.5, %v1658_v38  ;;  %v1650_v41 = vpop.f32.mrb[18].mxu0 }
 0x63b   :  { %v1651_v37 = vadd.f32 %v1650_v41, %v2997_v46  ;;  %v1652_v42 = vpop.f32.mrb[19].mxu0 }
 0x63c   :  { %2584 = vtanh.f32 %v1659_v40  ;;  %v1653_v52 = vadd.f32 %v1652_v42, %v3004_v48  ;;  %v2152_v42 = vld [vmem:[#allocation11] sm:$0xff] }
 0x63d   :  { %v1656_v49 = vadd.f32 %v1651_v37, %v1419_v63  ;;  %v2150_v37 = vld [vmem:[#allocation2] sm:$0xff] }
 0x63e   :  { %v1657_v57 = vadd.f32 %v1653_v52, %v1420_v7 }
 0x63f   :  { %v1663_v8 = vadd.f32 %v1656_v49, %v1511_v47  ;;  %v2153_v47 = vld [vmem:[#allocation11 + $0x8] sm:$0xff] }
 0x641   :  { %v1664_v43 = vmul.f32 0.5, %v1663_v8  ;;  %v2154_v8 = vld [vmem:[#allocation11 + $0x10] sm:$0xff] }
 0x643   :  { %2586 = vtanh.f32 %v1664_v43  ;;  %v2155_v43 = vld [vmem:[#allocation11 + $0x18] sm:$0xff] }
 0x646   :  { %v2585_v50 = vpop.eup %2584 }
 0x647   :  { %v1661_v51 = vmul.f32 0.5, %v2585_v50  ;;  %v2537_v50 = vpack.c.bf16 %v2155_v43, %v2154_v8 }
 0x649   :  { %v1662_v56 = vadd.f32 0.5, %v1661_v51 }
 0x64b   :  { %v1668_v58 = vmul.f32 %v1662_v56, %v1580_v53 }
 0x64d   :  { %v2587_v59 = vpop.eup %2586  ;;  %v1669_v55 = vadd.f32 %v1668_v58, %v1657_v57 }
 0x64e   :  { %v1666_v61 = vmul.f32 0.5, %v2587_v59 }
 0x64f   :  { %2588 = vtanh.f32 %v1669_v55 }
 0x650   :  { %v1667_v62 = vadd.f32 0.5, %v1666_v61 }
 0x652   :  { %v1671_v1 = vsub.f32 1.0, %v1667_v62  ;;  %v1673_v63 = vmul.f32 %v1667_v62, %v1437_v18 }
 0x659   :  { %v2589_v2 = vpop.eup %2588 }
 0x65a   :  { %v1672_v4 = vmul.f32 %v2589_v2, %v1671_v1 }
 0x65c   :  { %v1674_v5 = vadd.f32 %v1673_v63, %v1672_v4 }
 0x65e   :  { %1675 = vst.msk [vmem:[#allocation2 + $0xa] sm:$0x3] %vm489_vm4, %v1674_v5  ;;  %2316 = vmatmul.mubr.msk.f32.vlgmr.msra.gmra.mrb[18].mxu1 %vm327_vm3, %v1674_v5  ;;  %2317 = vmatmul.mubr.msk.f32.vlgmr.msra.gmra.mrb[20].mxu0 %vm327_vm3, %v1674_v5 }
 0x65f   :  { %2504 = vmatpush1.bf16.msra.mxu1 %v2963_v21  ;;  %1885 = vmatprep.mubr.f32.mxu1 %v2751_v0 }
 0x660   :  { %2506 = vmatprep.subr.bf16.mxu1 %v2965_v26  ;;  %2512 = vmatpush1.bf16.msra.mxu0 %v2879_v9 }
 0x661   :  { %2514 = vmatprep.subr.bf16.mxu0 %v2882_v12  ;;  %1980 = vmatprep.mubr.f32.mxu0 %v2751_v0 }
 0x663   :  { %2508 = vmatpush1.bf16.msra.mxu1 %v2971_v31 }
 0x664   :  { %2518 = vmatprep.subr.bf16.mxu1 %v2888_v19  ;;  %2516 = vmatpush1.bf16.msra.mxu0 %v2891_v23 }
 0x665   :  { %2526 = vmatprep.subr.bf16.mxu0 %v2925_v32 }
 0x666   :  { %2318 = vmatmul.mubr.msk.f32.vlgmr.msra.gmra.mrb[20].mxu1 %vm327_vm3, %v1674_v5 }
 0x667   :  { %2520 = vmatpush1.bf16.msra.mxu1 %v2894_v24  ;;  %2051 = vmatprep.mubr.f32.mxu1 %v2751_v0 }
 0x668   :  { %2522 = vmatprep.subr.bf16.mxu1 %v2896_v25 }
 0x66b   :  { %2524 = vmatpush1.bf16.msra.mxu1 %v2902_v28 }
 0x731   :  { %v1745_v9 = vpop.f32.mrb[18].mxu1  ;;  %v1816_v12 = vpop.f32.mrb[20].mxu0 }
 0x732   :  { %v1747_v54 = vpop.f32.mrb[19].mxu1  ;;  %v1818_v6 = vpop.f32.mrb[21].mxu0  ;;  %v1746_v23 = vadd.f32 %v1745_v9, %v2941_v44  ;;  %v1817_v3 = vadd.f32 %v1816_v12, %v2956_v60 }
 0x733   :  { %v1819_v19 = vadd.f32 %v1818_v6, %v2990_v33  ;;  %v1748_v25 = vadd.f32 %v1747_v54, %v2944_v45 }
 0x735   :  { %v1892_v34 = vadd.f32 %v1819_v19, %v1655_v36 }
 0x737   :  { %v1895_v32 = vadd.f32 %v1892_v34, %v1746_v23 }
 0x739   :  { %v1896_v7 = vmul.f32 0.5, %v1895_v32  ;;  %v1887_v10 = vpop.f32.mrb[20].mxu1 }
 0x73a   :  { %v1888_v24 = vadd.f32 %v1887_v10, %v2997_v46  ;;  %v1889_v39 = vpop.f32.mrb[21].mxu1 }
 0x73b   :  { %2590 = vtanh.f32 %v1896_v7  ;;  %v1890_v16 = vadd.f32 %v1889_v39, %v3004_v48  ;;  %v2244_v39 = vld [vmem:[%s3172_s1] sm:$0x3] }
 0x73c   :  { %v1893_v11 = vadd.f32 %v1888_v24, %v1656_v49  ;;  %v2533_v49 = vpack.c.bf16 %v2153_v47, %v2152_v42 }
 0x73d   :  { %v1894_v18 = vadd.f32 %v1890_v16, %v1657_v57 }
 0x73e   :  { %v1900_v28 = vadd.f32 %v1893_v11, %v1748_v25  ;;  %2534 = vmatprep.subr.bf16.mxu1 %v2533_v49 }
 0x740   :  { %v1901_v13 = vmul.f32 0.5, %v1900_v28 }
 0x742   :  { %2592 = vtanh.f32 %v1901_v13 }
 0x745   :  { %v2591_v14 = vpop.eup %2590 }
 0x746   :  { %v1898_v15 = vmul.f32 0.5, %v2591_v14 }
 0x748   :  { %v1899_v17 = vadd.f32 0.5, %v1898_v15 }
 0x74a   :  { %v1905_v22 = vmul.f32 %v1899_v17, %v1817_v3 }
 0x74c   :  { %v2593_v20 = vpop.eup %2592  ;;  %v1906_v27 = vadd.f32 %v1905_v22, %v1894_v18 }
 0x74d   :  { %v1903_v30 = vmul.f32 0.5, %v2593_v20 }
 0x74e   :  { %2594 = vtanh.f32 %v1906_v27 }
 0x74f   :  { %v1904_v29 = vadd.f32 0.5, %v1903_v30 }
 0x751   :  { %v1908_v35 = vsub.f32 1.0, %v1904_v29  ;;  %v1910_v38 = vmul.f32 %v1904_v29, %v1674_v5 }
 0x758   :  { %v2595_v36 = vpop.eup %2594 }
 0x759   :  { %v1909_v40 = vmul.f32 %v2595_v36, %v1908_v35 }
 0x75b   :  { %v1911_v41 = vadd.f32 %v1910_v38, %v1909_v40 }
 0x75d   :  { %1912 = vst.msk [vmem:[#allocation2 + $0xc] sm:$0x3] %vm489_vm4, %v1911_v41  ;;  %2319 = vmatmul.mubr.msk.f32.vlgmr.msra.gmra.mrb[22].mxu0 %vm327_vm3, %v1911_v41  ;;  %2320 = vmatmul.mubr.msk.f32.vlgmr.msra.gmra.mrb[22].mxu1 %vm327_vm3, %v1911_v41 }
 0x75e   :  { %2528 = vmatpush1.bf16.msra.mxu0 %v2963_v21  ;;  %2346 = vmatprep.mubr.msk.f32.mxu1 %vm327_vm3, %v2150_v37 }
 0x75f   :  { %2530 = vmatprep.subr.bf16.mxu0 %v2965_v26  ;;  %2122 = vmatprep.mubr.f32.mxu0 %v2751_v0 }
 0x760   :  { %2536 = vmatpush3.bf16.msra.mxu1 %v2533_v49 }
 0x761   :  { %2538 = vmatprep.subr.bf16.mxu1 %v2537_v50 }
 0x762   :  { %2532 = vmatpush1.bf16.msra.mxu0 %v2971_v31 }
 0x764   :  { %2540 = vmatpush3.bf16.msra.mxu1 %v2537_v50 }
 0x765   :  { %2321 = vmatmul.mubr.msk.f32.vlgmr.msra.gmra.mrb[24].mxu0 %vm327_vm3, %v1911_v41 }
 0x830   :  { %v1982_v21 = vpop.f32.mrb[22].mxu0  ;;  %v2053_v51 = vpop.f32.mrb[22].mxu1 }
 0x831   :  { %v1984_v52 = vpop.f32.mrb[23].mxu0  ;;  %v2055_v26 = vpop.f32.mrb[23].mxu1  ;;  %v1983_v31 = vadd.f32 %v1982_v21, %v2941_v44  ;;  %v2054_v44 = vadd.f32 %v2053_v51, %v2956_v60  ;;  %v2322_v60 = vld [vmem:[%s3179_s8] ss:$0 sm:$0xff]  ;;  %s2753_s8 = smov [#allocation12]  }
 0x832   :  { %v2056_v0 = vadd.f32 %v2055_v26, %v2990_v33  ;;  %v1985_v61 = vadd.f32 %v1984_v52, %v2944_v45  ;;  %s2280_s1 = sshll.u32 %s2753_s8, 4  ;;  %s2281_s1 = int_to_ptr.vmem [resolvable:$true] %s2280_s1 }
 0x833   :  { %s2712_s30 = scalar_lea.vmem %s2281_s1, 256  ;;  %p2717_p13 = scmp.lt.s32.totalorder %s2281_s1, %s2281_s1 }
 0x834   :  { %v2129_v53 = vadd.f32 %v2056_v0, %v1892_v34  ;;  %p2713_p12 = scmp.ne.s32.totalorder %s2281_s1, %s2712_s30  ;;  %p2718_p0 = scmp.lt.s32.totalorder %s2712_s30, %s2712_s30 }
 0x836   :  { %v2132_v56 = vadd.f32 %v2129_v53, %v1983_v31  ;;  %p2719_p1 = por %p2718_p0, %p2717_p13 }
 0x838   :  { %v2133_v57 = vmul.f32 0.5, %v2132_v56  ;;  %v2124_v58 = vpop.f32.mrb[24].mxu0  ;;  %p2720_p2 = pnand %p2719_p1, %p2713_p12 }
 0x839   :  { %v2125_v59 = vadd.f32 %v2124_v58, %v2997_v46  ;;  %v2126_v55 = vpop.f32.mrb[25].mxu0 }
 0x83a   :  { %2596 = vtanh.f32 %v2133_v57  ;;  %v2127_v33 = vadd.f32 %v2126_v55, %v3004_v48 }
 0x83b   :  { %v2130_v62 = vadd.f32 %v2125_v59, %v1893_v11 }
 0x83c   :  { %v2131_v9 = vadd.f32 %v2127_v33, %v1894_v18 }
 0x83d   :  { %v2137_v1 = vadd.f32 %v2130_v62, %v1985_v61 }
 0x83f   :  { %v2138_v2 = vmul.f32 0.5, %v2137_v1 }
 0x841   :  { %2598 = vtanh.f32 %v2138_v2 }
 0x844   :  { %v2597_v63 = vpop.eup %2596 }
 0x845   :  { %v2135_v4 = vmul.f32 0.5, %v2597_v63 }
 0x847   :  { %v2136_v5 = vadd.f32 0.5, %v2135_v4 }
 0x849   :  { %v2142_v12 = vmul.f32 %v2136_v5, %v2054_v44 }
 0x84b   :  { %v2599_v54 = vpop.eup %2598  ;;  %v2143_v6 = vadd.f32 %v2142_v12, %v2131_v9 }
 0x84c   :  { %v2140_v46 = vmul.f32 0.5, %v2599_v54 }
 0x84d   :  { %2600 = vtanh.f32 %v2143_v6 }
 0x84e   :  { %v2141_v19 = vadd.f32 0.5, %v2140_v46 }
 0x850   :  { %v2145_v23 = vsub.f32 1.0, %v2141_v19  ;;  %v2147_v34 = vmul.f32 %v2141_v19, %v1911_v41 }
 0x857   :  { %v2601_v45 = vpop.eup %2600 }
 0x858   :  { %v2146_v32 = vmul.f32 %v2601_v45, %v2145_v23 }
 0x85a   :  { %v2148_v7 = vadd.f32 %v2147_v34, %v2146_v32 }
 0x85c   :  { %2149 = vst.msk [vmem:[#allocation2 + $0xe] sm:$0x3] %vm489_vm4, %v2148_v7 }
 0x863   :  { %v2151_v10 = vld [vmem:[#allocation2 + $0x8] sm:$0xff] }
 0x864   :  { %2347 = vmatmul.mubr.msk.f32.vlgmr.msra.gmra.mrb[24].mxu1 %vm327_vm3, %v2151_v10 }
 0x937   :  { %v2348_v48 = vpop.f32.mrb[24].mxu1 }
 0x938   :  { %v2235_v24 = vpop.f32.mrb[25].mxu1  ;;  %v2241_v15 = vadd.f32 %v2348_v48, %v2322_v60 }
 0x939   :  { %v2236_v25 = vadd.f32 %v2322_v60, %v2235_v24 }
 0x93a   :  { %v2263_v18 = vrot.slane %v2241_v15, 2  ;;  %v2267_v20 = vrot.slane %v2241_v15, 4  ;;  %v2271_v30 = vrot.slane %v2241_v15, 6 }
 0x93b   :  { %v2245_v11 = vadd.f32 %v2244_v39, %v2236_v25  ;;  %v2248_v28 = vrot.slane %v2236_v25, 2  ;;  %v2252_v14 = vrot.slane %v2236_v25, 4  ;;  %v2256_v3 = vrot.slane %v2236_v25, 6 }
 0x93d   :  { %2246 = vst [vmem:[#allocation12] sm:$0x3] %v2245_v11  ;;  %v2250_v13 = vadd.f32 %v2248_v28, %v2245_v11 }
 0x93f   :  { %2251 = vst [vmem:[#allocation12 + $0x2] sm:$0x3] %v2250_v13  ;;  %v2254_v16 = vadd.f32 %v2252_v14, %v2250_v13 }
 0x941   :  { %2255 = vst [vmem:[#allocation12 + $0x4] sm:$0x3] %v2254_v16  ;;  %v2258_v17 = vadd.f32 %v2256_v3, %v2254_v16 }
 0x943   :  { %2259 = vst [vmem:[#allocation12 + $0x6] sm:$0x3] %v2258_v17  ;;  %v2260_v22 = vadd.f32 %v2258_v17, %v2241_v15 }
 0x945   :  { %2261 = vst [vmem:[#allocation12 + $0x8] sm:$0x3] %v2260_v22  ;;  %v2265_v27 = vadd.f32 %v2263_v18, %v2260_v22 }
 0x947   :  { %2266 = vst [vmem:[#allocation12 + $0xa] sm:$0x3] %v2265_v27  ;;  %v2269_v29 = vadd.f32 %v2267_v20, %v2265_v27 }
 0x949   :  { %2270 = vst [vmem:[#allocation12 + $0xc] sm:$0x3] %v2269_v29  ;;  %v2273_v35 = vadd.f32 %v2271_v30, %v2269_v29 }
 0x94b   :  { %2274 = vst [vmem:[#allocation12 + $0xe] sm:$0x3] %v2273_v35 }
 0x94c   :  { %2723 = shalt.err (!%p2720_p2)
}
 0x94d   :  { %s2724_s11 = scalar_lea.hbm %s3180_s9, 256 }
 0x94e   :  { %p2725_p3 = scmp.ne.s32.totalorder %s3180_s9, %s2724_s11  ;;  %p2728_p4 = scmp.lt.u32.totalorder %s2724_s11, %s3180_s9 }
 0x950   :  { %p2730_p5 = pnand %p2728_p4, %p2725_p3 }
 0x952   :  { %2733 = shalt.err (!%p2730_p5)
}
 0x953   :  { %2286 = dma.vmem_to_hbm [thread:$0]  %s2281_s1, 256, %s3180_s9, [#allocation5], %s2749_s3, %s2749_s3, %s2750_s17  }
 0x954   :  { %2740 = dma.done.wait [#allocation5], 256  }
 0x955   :  { %2741 = vsyncadd [#allocation5], 4294967040 }
 0x956   :  { %2290 = vsyncpa [#allocation4], 1 }
 0x957   :  { %2291 = vsyncpa [#allocation7], 1 }
 0x958   :  { %2292 = vsyncpa [#allocation10], 1 }
 0x959   :  { %2293 = vsyncpa [#allocation5], 1 }

</bundles_post_ra>
